<compile_context>
chip_gen: v6e
topology: v6e:2x2x1
jax: 0.10.0
libtpu: 0.0.40
codegen_flags: <defaults>
</compile_context>

<pallas_src>
import functools

import jax
import jax.numpy as jnp
from jax.experimental import pallas as pl
from jax.experimental.pallas import tpu as pltpu

S_HINGES = 2          # APL S=2
N_CLASSES = 10
N_PAD = 128           # lane-dense padded class dim (and padded fc3-out/fc4-in dim)
H3_PAD = 128          # fc3 output padded from 64 -> 128
NEG_BIG = -1e30       # "minus infinity" for padded logit lanes (kept in f32 math)


def _round_up(x, m):
    return (x + m - 1) // m * m


def _plan_batch(B):
    """Pad B to a multiple of 128, then pick the largest tb in {1024..64}
    dividing B_pad that keeps grid >= 2 (two TensorCores on v7x)."""
    B_pad = _round_up(max(B, 1), 128)
    for tb in (1024, 512, 256, 128, 64):
        if B_pad % tb == 0 and B_pad // tb >= 2:
            return B_pad, tb
    return B_pad, min(B_pad, 128)   # unreachable for B_pad >= 128


def _apl_dtype():
    """bf16 activation math on bf16-VPU generations (v6e/v7x), f32 otherwise."""
    try:
        kind = jax.devices()[0].device_kind.lower()
    except Exception:
        return jnp.bfloat16
    if any(tag in kind for tag in ("v2", "v3", "v4", "v5")):
        return jnp.float32
    return jnp.bfloat16


def classifier_kernel(
    x_ref,
    w1_ref, p1_ref,
    w2_ref, p2_ref,
    w3_ref, p3_ref,
    w4_ref, b4_ref,
    o_ref,
    *, apl_dtype,
):
    """x_ref: (tb, 784) f32 (cast to bf16 in-kernel). w*: bf16 (in, out).
    p*: (1+2S, F) f32 packed as [bias; a_0..a_{S-1}; b_0..b_{S-1}].
    b4_ref: (1, 128) f32 with padded lanes = -1e30. o_ref: (tb, 128) bf16."""

    def layer(h_bf16, w_ref, p_ref):
        p = p_ref[...]                                  # (1+2S, F) f32
        h = jnp.dot(h_bf16, w_ref[...],
                    preferred_element_type=jnp.float32) + p[0:1, :]
        h = h.astype(apl_dtype)                         # APL chain dtype (gen-gated)
        pa = p.astype(apl_dtype)
        out = jnp.maximum(h, 0)
        for s in range(S_HINGES):
            a_s = pa[1 + s: 2 + s, :]
            t_s = pa[1 + S_HINGES + s: 2 + S_HINGES + s, :]
            out = out + a_s * jnp.maximum(t_s - h, 0)
        return out.astype(jnp.bfloat16)                 # bf16 operand for next MXU pass

    h = layer(x_ref[...].astype(jnp.bfloat16), w1_ref, p1_ref)
    h = layer(h, w2_ref, p2_ref)
    h = layer(h, w3_ref, p3_ref)                        # (tb, 128) — lanes 64..127 are 0

    # fc4 (padded to 128 lanes) + log_softmax in f32; padded lanes have bias
    # -1e30 so they never win the max and contribute exp(..)=0 to the sum.
    logits = jnp.dot(h, w4_ref[...],
                     preferred_element_type=jnp.float32) + b4_ref[...]
    m = jnp.max(logits, axis=-1, keepdims=True)
    z = logits - m
    lse = jnp.log(jnp.sum(jnp.exp(z), axis=-1, keepdims=True))
    o_ref[...] = (z - lse).astype(o_ref.dtype)


def classifier_forward(x_nchw, params, *, tb=None):
    """x_nchw: (B, 1, 28, 28) float32 -> (B, 10) log-probs (float32)."""
    B = x_nchw.shape[0]
    x = x_nchw.reshape(B, -1).astype(jnp.float32)       # same as torch x.view(B, -1)
    assert x.shape[1] == 784

    if tb is None:
        B_pad, tb = _plan_batch(B)
    else:
        B_pad = _round_up(B, tb)
    if B_pad != B:
        x = jnp.pad(x, ((0, B_pad - B), (0, 0)))        # f32 pad only, no cast pass

    (w1, b1, a1, t1, w2, b2, a2, t2, w3, b3, a3, t3, w4, b4) = params

    def pack(b, a, t, pad_to=None):  # -> (1+2S, F[pad]) f32
        p = jnp.concatenate([b.reshape(1, -1), a, t], axis=0).astype(jnp.float32)
        if pad_to is not None and pad_to > p.shape[1]:
            p = jnp.pad(p, ((0, 0), (0, pad_to - p.shape[1])))  # bias=a=t=0 => APL(0)=0
        return p

    p1 = pack(b1, a1, t1)
    p2 = pack(b2, a2, t2)
    p3 = pack(b3, a3, t3, pad_to=H3_PAD)                # fc3 out padded 64 -> 128
    w1b = w1.astype(jnp.bfloat16)
    w2b = w2.astype(jnp.bfloat16)
    w3b = jnp.pad(w3, ((0, 0), (0, H3_PAD - w3.shape[1]))).astype(jnp.bfloat16)
    # fc4: pad in-dim 64 -> 128 (zero rows) and out-dim 10 -> 128 (zero cols).
    w4b = jnp.pad(
        w4, ((0, H3_PAD - w4.shape[0]), (0, N_PAD - w4.shape[1]))
    ).astype(jnp.bfloat16)
    b4p = jnp.concatenate(
        [b4.reshape(1, -1).astype(jnp.float32),
         jnp.full((1, N_PAD - b4.shape[-1]), NEG_BIG, jnp.float32)], axis=1)

    def full(arr):  # whole-array block, VMEM-resident across the batch grid
        return pl.BlockSpec(arr.shape, lambda i, n=arr.ndim: (0,) * n)

    grid = (B_pad // tb,)
    weight_bytes = sum(int(a.size) * a.dtype.itemsize
                       for a in (w1b, p1, w2b, p2, w3b, p3, w4b, b4p))
    cost = pl.CostEstimate(
        flops=2 * B_pad * (784 * 256 + 256 * 128 + 128 * H3_PAD + H3_PAD * N_PAD),
        transcendentals=B_pad * (N_PAD + 1),
        bytes_accessed=B_pad * 784 * 4 + weight_bytes + B_pad * N_PAD * 2,
    )

    out = pl.pallas_call(
        functools.partial(classifier_kernel, apl_dtype=_apl_dtype()),
        out_shape=jax.ShapeDtypeStruct((B_pad, N_PAD), jnp.bfloat16),
        grid_spec=pltpu.PrefetchScalarGridSpec(
            num_scalar_prefetch=0,
            grid=grid,
            in_specs=[
                pl.BlockSpec((tb, 784), lambda i: (i, 0)),
                full(w1b), full(p1),
                full(w2b), full(p2),
                full(w3b), full(p3),
                full(w4b), full(b4p),
            ],
            out_specs=pl.BlockSpec((tb, N_PAD), lambda i: (i, 0)),
        ),
        compiler_params=pltpu.CompilerParams(
            dimension_semantics=("parallel",),
            vmem_limit_bytes=32 * 1024 * 1024,
        ),
        cost_estimate=cost,
    )(x, w1b, p1, w2b, p2, w3b, p3, w4b, b4p)
    return out[:B, :N_CLASSES].astype(jnp.float32)


def init_params(key):
    """Deterministic synthetic params matching the module's shapes (f32 master copies)."""
    dims = [(784, 256), (256, 128), (128, 64), (64, 10)]
    params = []
    keys = jax.random.split(key, 20)
    ki = 0
    for li, (fin, fout) in enumerate(dims):
        bound = 1.0 / jnp.sqrt(fin)
        w = jax.random.uniform(keys[ki], (fin, fout), jnp.float32, -bound, bound); ki += 1
        b = jax.random.uniform(keys[ki], (1, fout), jnp.float32, -bound, bound); ki += 1
        params += [w, b]
        if li < 3:  # APL params follow fc1/fc2/fc3 only
            a = 0.1 * jax.random.normal(keys[ki], (S_HINGES, fout), jnp.float32); ki += 1
            t = 0.1 * jax.random.normal(keys[ki], (S_HINGES, fout), jnp.float32); ki += 1
            params += [a, t]
    return tuple(params)


def reference_forward(x_nchw, params):
    """Pure-JAX f32 reference."""
    (w1, b1, a1, t1, w2, b2, a2, t2, w3, b3, a3, t3, w4, b4) = params
    x = x_nchw.reshape(x_nchw.shape[0], -1)

    def apl(h, a, t):
        out = jnp.maximum(h, 0.0)
        for s in range(S_HINGES):
            out = out + a[s][None, :] * jnp.maximum(-h + t[s][None, :], 0.0)
        return out

    h = apl(x @ w1 + b1, a1, t1)
    h = apl(h @ w2 + b2, a2, t2)
    h = apl(h @ w3 + b3, a3, t3)
    logits = h @ w4 + b4
    return jax.nn.log_softmax(logits, axis=1)


if __name__ == "__main__":
    key = jax.random.PRNGKey(0)
    k_x, k_p = jax.random.split(key)

    B = 8  # small demo batch; wrapper pads to 128 rows (tb=64, grid=2) internally
    x = jax.random.normal(k_x, (B, 1, 28, 28), jnp.float32)  # NCHW -> flattens to 784
    params = init_params(k_p)

    out = classifier_forward(x, params)
    out = jax.block_until_ready(out)

    ref = reference_forward(x, params)
    assert out.shape == (B, N_CLASSES)
    # bf16 operands / bf16 APL on v6e+/bf16 output (f32 accumulation & softmax)
    # -> loosened tolerance vs f32 reference.
    assert jnp.allclose(out, ref, atol=5e-2, rtol=5e-2), "mismatch vs JAX reference"
    assert bool(jnp.all(jnp.isfinite(out))), "non-finite log-probs"

    print("KERNEL_OK")
</pallas_src>

<mosaic_0001>
module attributes {stable_mosaic.version = 11 : i64} {
  func.func @classifier_kernel(%arg0: i32, %arg1: memref<64x784xf32, #tpu.memory_space<vmem>>, %arg2: memref<784x256xbf16, #tpu.memory_space<vmem>>, %arg3: memref<5x256xf32, #tpu.memory_space<vmem>>, %arg4: memref<256x128xbf16, #tpu.memory_space<vmem>>, %arg5: memref<5x128xf32, #tpu.memory_space<vmem>>, %arg6: memref<128x128xbf16, #tpu.memory_space<vmem>>, %arg7: memref<5x128xf32, #tpu.memory_space<vmem>>, %arg8: memref<128x128xbf16, #tpu.memory_space<vmem>>, %arg9: memref<1x128xf32, #tpu.memory_space<vmem>>, %arg10: memref<64x128xbf16, #tpu.memory_space<vmem>>) attributes {dimension_semantics = [#tpu.dimension_semantics<parallel>], iteration_bounds = array<i64: 2>, scalar_prefetch = 0 : i64, scratch_operands = 0 : i64, tpu.core_type = #tpu.core_type<tc>, window_params = [{transform_indices = @transform_0, window_bounds = array<i64: 64, 784>}, {pipeline_mode = #tpu.pipeline_mode<synchronous>, transform_indices = @transform_1, window_bounds = array<i64: 784, 256>}, {pipeline_mode = #tpu.pipeline_mode<synchronous>, transform_indices = @transform_2, window_bounds = array<i64: 5, 256>}, {pipeline_mode = #tpu.pipeline_mode<synchronous>, transform_indices = @transform_3, window_bounds = array<i64: 256, 128>}, {pipeline_mode = #tpu.pipeline_mode<synchronous>, transform_indices = @transform_4, window_bounds = array<i64: 5, 128>}, {pipeline_mode = #tpu.pipeline_mode<synchronous>, transform_indices = @transform_5, window_bounds = array<i64: 128, 128>}, {pipeline_mode = #tpu.pipeline_mode<synchronous>, transform_indices = @transform_6, window_bounds = array<i64: 5, 128>}, {pipeline_mode = #tpu.pipeline_mode<synchronous>, transform_indices = @transform_7, window_bounds = array<i64: 128, 128>}, {pipeline_mode = #tpu.pipeline_mode<synchronous>, transform_indices = @transform_8, window_bounds = array<i64: 1, 128>}, {transform_indices = @transform_9, window_bounds = array<i64: 64, 128>}]} {
    %c0 = arith.constant 0 : index
    %c0_0 = arith.constant 0 : index
    %0 = vector.load %arg1[%c0, %c0_0] : memref<64x784xf32, #tpu.memory_space<vmem>>, vector<64x784xf32>
    %1 = arith.truncf %0 : vector<64x784xf32> to vector<64x784xbf16>
    %c0_1 = arith.constant 0 : index
    %c0_2 = arith.constant 0 : index
    %2 = vector.load %arg3[%c0_1, %c0_2] : memref<5x256xf32, #tpu.memory_space<vmem>>, vector<5x256xf32>
    %c0_3 = arith.constant 0 : index
    %c0_4 = arith.constant 0 : index
    %3 = vector.load %arg2[%c0_3, %c0_4] : memref<784x256xbf16, #tpu.memory_space<vmem>>, vector<784x256xbf16>
    %cst = arith.constant dense<0.000000e+00> : vector<64x256xf32>
    %4 = tpu.matmul %1, %3, %cst {dimension_numbers = #tpu.dot_dimension_numbers<[1], [0], [0], [1], [0, 0, 1, 1], [], []>} : vector<64x784xbf16>, vector<784x256xbf16>, vector<64x256xf32> -> vector<64x256xf32>
    %5 = vector.extract_strided_slice %2 {offsets = [0, 0], sizes = [1, 256], strides = [1, 1]} : vector<5x256xf32> to vector<1x256xf32>
    %6 = vector.broadcast %5 : vector<1x256xf32> to vector<64x256xf32>
    %7 = arith.addf %4, %6 : vector<64x256xf32>
    %8 = arith.truncf %7 : vector<64x256xf32> to vector<64x256xbf16>
    %9 = arith.truncf %2 : vector<5x256xf32> to vector<5x256xbf16>
    %cst_5 = arith.constant 0.000000e+00 : bf16
    %10 = vector.broadcast %cst_5 : bf16 to vector<64x256xbf16>
    %11 = arith.maximumf %8, %10 : vector<64x256xbf16>
    %12 = vector.extract_strided_slice %9 {offsets = [1, 0], sizes = [1, 256], strides = [1, 1]} : vector<5x256xbf16> to vector<1x256xbf16>
    %13 = vector.extract_strided_slice %9 {offsets = [3, 0], sizes = [1, 256], strides = [1, 1]} : vector<5x256xbf16> to vector<1x256xbf16>
    %14 = vector.broadcast %13 : vector<1x256xbf16> to vector<64x256xbf16>
    %15 = arith.subf %14, %8 : vector<64x256xbf16>
    %cst_6 = arith.constant 0.000000e+00 : bf16
    %16 = vector.broadcast %cst_6 : bf16 to vector<64x256xbf16>
    %17 = arith.maximumf %15, %16 : vector<64x256xbf16>
    %18 = vector.broadcast %12 : vector<1x256xbf16> to vector<64x256xbf16>
    %19 = arith.mulf %18, %17 : vector<64x256xbf16>
    %20 = arith.addf %11, %19 : vector<64x256xbf16>
    %21 = vector.extract_strided_slice %9 {offsets = [2, 0], sizes = [1, 256], strides = [1, 1]} : vector<5x256xbf16> to vector<1x256xbf16>
    %22 = vector.extract_strided_slice %9 {offsets = [4, 0], sizes = [1, 256], strides = [1, 1]} : vector<5x256xbf16> to vector<1x256xbf16>
    %23 = vector.broadcast %22 : vector<1x256xbf16> to vector<64x256xbf16>
    %24 = arith.subf %23, %8 : vector<64x256xbf16>
    %cst_7 = arith.constant 0.000000e+00 : bf16
    %25 = vector.broadcast %cst_7 : bf16 to vector<64x256xbf16>
    %26 = arith.maximumf %24, %25 : vector<64x256xbf16>
    %27 = vector.broadcast %21 : vector<1x256xbf16> to vector<64x256xbf16>
    %28 = arith.mulf %27, %26 : vector<64x256xbf16>
    %29 = arith.addf %20, %28 : vector<64x256xbf16>
    %c0_8 = arith.constant 0 : index
    %c0_9 = arith.constant 0 : index
    %30 = vector.load %arg5[%c0_8, %c0_9] : memref<5x128xf32, #tpu.memory_space<vmem>>, vector<5x128xf32>
    %c0_10 = arith.constant 0 : index
    %c0_11 = arith.constant 0 : index
    %31 = vector.load %arg4[%c0_10, %c0_11] : memref<256x128xbf16, #tpu.memory_space<vmem>>, vector<256x128xbf16>
    %cst_12 = arith.constant dense<0.000000e+00> : vector<64x128xf32>
    %32 = tpu.matmul %29, %31, %cst_12 {dimension_numbers = #tpu.dot_dimension_numbers<[1], [0], [0], [1], [0, 0, 1, 1], [], []>} : vector<64x256xbf16>, vector<256x128xbf16>, vector<64x128xf32> -> vector<64x128xf32>
    %33 = vector.extract_strided_slice %30 {offsets = [0, 0], sizes = [1, 128], strides = [1, 1]} : vector<5x128xf32> to vector<1x128xf32>
    %34 = vector.broadcast %33 : vector<1x128xf32> to vector<64x128xf32>
    %35 = arith.addf %32, %34 : vector<64x128xf32>
    %36 = arith.truncf %35 : vector<64x128xf32> to vector<64x128xbf16>
    %37 = arith.truncf %30 : vector<5x128xf32> to vector<5x128xbf16>
    %cst_13 = arith.constant 0.000000e+00 : bf16
    %38 = vector.broadcast %cst_13 : bf16 to vector<64x128xbf16>
    %39 = arith.maximumf %36, %38 : vector<64x128xbf16>
    %40 = vector.extract_strided_slice %37 {offsets = [1, 0], sizes = [1, 128], strides = [1, 1]} : vector<5x128xbf16> to vector<1x128xbf16>
    %41 = vector.extract_strided_slice %37 {offsets = [3, 0], sizes = [1, 128], strides = [1, 1]} : vector<5x128xbf16> to vector<1x128xbf16>
    %42 = vector.broadcast %41 : vector<1x128xbf16> to vector<64x128xbf16>
    %43 = arith.subf %42, %36 : vector<64x128xbf16>
    %cst_14 = arith.constant 0.000000e+00 : bf16
    %44 = vector.broadcast %cst_14 : bf16 to vector<64x128xbf16>
    %45 = arith.maximumf %43, %44 : vector<64x128xbf16>
    %46 = vector.broadcast %40 : vector<1x128xbf16> to vector<64x128xbf16>
    %47 = arith.mulf %46, %45 : vector<64x128xbf16>
    %48 = arith.addf %39, %47 : vector<64x128xbf16>
    %49 = vector.extract_strided_slice %37 {offsets = [2, 0], sizes = [1, 128], strides = [1, 1]} : vector<5x128xbf16> to vector<1x128xbf16>
    %50 = vector.extract_strided_slice %37 {offsets = [4, 0], sizes = [1, 128], strides = [1, 1]} : vector<5x128xbf16> to vector<1x128xbf16>
    %51 = vector.broadcast %50 : vector<1x128xbf16> to vector<64x128xbf16>
    %52 = arith.subf %51, %36 : vector<64x128xbf16>
    %cst_15 = arith.constant 0.000000e+00 : bf16
    %53 = vector.broadcast %cst_15 : bf16 to vector<64x128xbf16>
    %54 = arith.maximumf %52, %53 : vector<64x128xbf16>
    %55 = vector.broadcast %49 : vector<1x128xbf16> to vector<64x128xbf16>
    %56 = arith.mulf %55, %54 : vector<64x128xbf16>
    %57 = arith.addf %48, %56 : vector<64x128xbf16>
    %c0_16 = arith.constant 0 : index
    %c0_17 = arith.constant 0 : index
    %58 = vector.load %arg7[%c0_16, %c0_17] : memref<5x128xf32, #tpu.memory_space<vmem>>, vector<5x128xf32>
    %c0_18 = arith.constant 0 : index
    %c0_19 = arith.constant 0 : index
    %59 = vector.load %arg6[%c0_18, %c0_19] : memref<128x128xbf16, #tpu.memory_space<vmem>>, vector<128x128xbf16>
    %cst_20 = arith.constant dense<0.000000e+00> : vector<64x128xf32>
    %60 = tpu.matmul %57, %59, %cst_20 {dimension_numbers = #tpu.dot_dimension_numbers<[1], [0], [0], [1], [0, 0, 1, 1], [], []>} : vector<64x128xbf16>, vector<128x128xbf16>, vector<64x128xf32> -> vector<64x128xf32>
    %61 = vector.extract_strided_slice %58 {offsets = [0, 0], sizes = [1, 128], strides = [1, 1]} : vector<5x128xf32> to vector<1x128xf32>
    %62 = vector.broadcast %61 : vector<1x128xf32> to vector<64x128xf32>
    %63 = arith.addf %60, %62 : vector<64x128xf32>
    %64 = arith.truncf %63 : vector<64x128xf32> to vector<64x128xbf16>
    %65 = arith.truncf %58 : vector<5x128xf32> to vector<5x128xbf16>
    %cst_21 = arith.constant 0.000000e+00 : bf16
    %66 = vector.broadcast %cst_21 : bf16 to vector<64x128xbf16>
    %67 = arith.maximumf %64, %66 : vector<64x128xbf16>
    %68 = vector.extract_strided_slice %65 {offsets = [1, 0], sizes = [1, 128], strides = [1, 1]} : vector<5x128xbf16> to vector<1x128xbf16>
    %69 = vector.extract_strided_slice %65 {offsets = [3, 0], sizes = [1, 128], strides = [1, 1]} : vector<5x128xbf16> to vector<1x128xbf16>
    %70 = vector.broadcast %69 : vector<1x128xbf16> to vector<64x128xbf16>
    %71 = arith.subf %70, %64 : vector<64x128xbf16>
    %cst_22 = arith.constant 0.000000e+00 : bf16
    %72 = vector.broadcast %cst_22 : bf16 to vector<64x128xbf16>
    %73 = arith.maximumf %71, %72 : vector<64x128xbf16>
    %74 = vector.broadcast %68 : vector<1x128xbf16> to vector<64x128xbf16>
    %75 = arith.mulf %74, %73 : vector<64x128xbf16>
    %76 = arith.addf %67, %75 : vector<64x128xbf16>
    %77 = vector.extract_strided_slice %65 {offsets = [2, 0], sizes = [1, 128], strides = [1, 1]} : vector<5x128xbf16> to vector<1x128xbf16>
    %78 = vector.extract_strided_slice %65 {offsets = [4, 0], sizes = [1, 128], strides = [1, 1]} : vector<5x128xbf16> to vector<1x128xbf16>
    %79 = vector.broadcast %78 : vector<1x128xbf16> to vector<64x128xbf16>
    %80 = arith.subf %79, %64 : vector<64x128xbf16>
    %cst_23 = arith.constant 0.000000e+00 : bf16
    %81 = vector.broadcast %cst_23 : bf16 to vector<64x128xbf16>
    %82 = arith.maximumf %80, %81 : vector<64x128xbf16>
    %83 = vector.broadcast %77 : vector<1x128xbf16> to vector<64x128xbf16>
    %84 = arith.mulf %83, %82 : vector<64x128xbf16>
    %85 = arith.addf %76, %84 : vector<64x128xbf16>
    %c0_24 = arith.constant 0 : index
    %c0_25 = arith.constant 0 : index
    %86 = vector.load %arg8[%c0_24, %c0_25] : memref<128x128xbf16, #tpu.memory_space<vmem>>, vector<128x128xbf16>
    %cst_26 = arith.constant dense<0.000000e+00> : vector<64x128xf32>
    %87 = tpu.matmul %85, %86, %cst_26 {dimension_numbers = #tpu.dot_dimension_numbers<[1], [0], [0], [1], [0, 0, 1, 1], [], []>} : vector<64x128xbf16>, vector<128x128xbf16>, vector<64x128xf32> -> vector<64x128xf32>
    %c0_27 = arith.constant 0 : index
    %c0_28 = arith.constant 0 : index
    %88 = vector.load %arg9[%c0_27, %c0_28] : memref<1x128xf32, #tpu.memory_space<vmem>>, vector<1x128xf32>
    %89 = vector.broadcast %88 : vector<1x128xf32> to vector<64x128xf32>
    %90 = arith.addf %87, %89 : vector<64x128xf32>
    %cst_29 = arith.constant dense<0xFF800000> : vector<64xf32>
    %91 = vector.multi_reduction <maximumf>, %90, %cst_29 [1] : vector<64x128xf32> to vector<64xf32>
    %92 = vector.shape_cast %91 : vector<64xf32> to vector<64x1xf32>
    %93 = vector.broadcast %92 : vector<64x1xf32> to vector<64x128xf32>
    %94 = arith.subf %90, %93 : vector<64x128xf32>
    %95 = math.exp %94 : vector<64x128xf32>
    %cst_30 = arith.constant dense<0.000000e+00> : vector<64xf32>
    %96 = vector.multi_reduction <add>, %95, %cst_30 [1] : vector<64x128xf32> to vector<64xf32>
    %97 = vector.shape_cast %96 : vector<64xf32> to vector<64x1xf32>
    %98 = math.log %97 : vector<64x1xf32>
    %99 = vector.broadcast %98 : vector<64x1xf32> to vector<64x128xf32>
    %100 = arith.subf %94, %99 : vector<64x128xf32>
    %101 = arith.truncf %100 : vector<64x128xf32> to vector<64x128xbf16>
    %c0_31 = arith.constant 0 : index
    %c0_32 = arith.constant 0 : index
    %102 = vector.load %arg10[%c0_31, %c0_32] : memref<64x128xbf16, #tpu.memory_space<vmem>>, vector<64x128xbf16>
    tpu.vector_store %arg10[%c0_31, %c0_32], %101 {strides = array<i32>} : memref<64x128xbf16, #tpu.memory_space<vmem>>, vector<64x128xbf16>,
    return
  }
  func.func @transform_0(%arg0: i32) -> (i32, i32) {
    %c0_i32 = arith.constant 0 : i32
    %c0_i32_0 = arith.constant 0 : i32
    return %arg0, %c0_i32 : i32, i32
  }
  func.func @transform_1(%arg0: i32) -> (i32, i32) {
    %c0_i32 = arith.constant 0 : i32
    %c0_i32_0 = arith.constant 0 : i32
    %c0_i32_1 = arith.constant 0 : i32
    return %c0_i32, %c0_i32_0 : i32, i32
  }
  func.func @transform_2(%arg0: i32) -> (i32, i32) {
    %c0_i32 = arith.constant 0 : i32
    %c0_i32_0 = arith.constant 0 : i32
    %c0_i32_1 = arith.constant 0 : i32
    return %c0_i32, %c0_i32_0 : i32, i32
  }
  func.func @transform_3(%arg0: i32) -> (i32, i32) {
    %c0_i32 = arith.constant 0 : i32
    %c0_i32_0 = arith.constant 0 : i32
    %c0_i32_1 = arith.constant 0 : i32
    return %c0_i32, %c0_i32_0 : i32, i32
  }
  func.func @transform_4(%arg0: i32) -> (i32, i32) {
    %c0_i32 = arith.constant 0 : i32
    %c0_i32_0 = arith.constant 0 : i32
    %c0_i32_1 = arith.constant 0 : i32
    return %c0_i32, %c0_i32_0 : i32, i32
  }
  func.func @transform_5(%arg0: i32) -> (i32, i32) {
    %c0_i32 = arith.constant 0 : i32
    %c0_i32_0 = arith.constant 0 : i32
    %c0_i32_1 = arith.constant 0 : i32
    return %c0_i32, %c0_i32_0 : i32, i32
  }
  func.func @transform_6(%arg0: i32) -> (i32, i32) {
    %c0_i32 = arith.constant 0 : i32
    %c0_i32_0 = arith.constant 0 : i32
    %c0_i32_1 = arith.constant 0 : i32
    return %c0_i32, %c0_i32_0 : i32, i32
  }
  func.func @transform_7(%arg0: i32) -> (i32, i32) {
    %c0_i32 = arith.constant 0 : i32
    %c0_i32_0 = arith.constant 0 : i32
    %c0_i32_1 = arith.constant 0 : i32
    return %c0_i32, %c0_i32_0 : i32, i32
  }
  func.func @transform_8(%arg0: i32) -> (i32, i32) {
    %c0_i32 = arith.constant 0 : i32
    %c0_i32_0 = arith.constant 0 : i32
    %c0_i32_1 = arith.constant 0 : i32
    return %c0_i32, %c0_i32_0 : i32, i32
  }
  func.func @transform_9(%arg0: i32) -> (i32, i32) {
    %c0_i32 = arith.constant 0 : i32
    %c0_i32_0 = arith.constant 0 : i32
    return %arg0, %c0_i32 : i32, i32
  }
}

</mosaic_0001>

<bundles_post_ra>
// kernel: tpu_custom_call.1
= control target key start
LH: loop header
LB: loop body
LE: loop exit
PB: predicated region body
PF: predicated region fallthrough
CT: control target
= control target key end

     0   :  { %14 = vsyncpa [#allocation3], 0  ;;  %s3753_s0 = inlined_call_operand.vmem [shape: f32[128,784], index: 0, kind: input, shape index: {}]   ;;  %s3754_s1 = inlined_call_operand.vmem [shape: bf16[784,256], index: 1, kind: input, shape index: {}]   ;;  %s3755_s2 = inlined_call_operand.vmem [shape: f32[5,256], index: 2, kind: input, shape index: {}]   ;;  %s3756_s3 = inlined_call_operand.vmem [shape: bf16[256,128], index: 3, kind: input, shape index: {}]   ;;  %s3757_s4 = inlined_call_operand.vmem [shape: f32[5,128], index: 4, kind: input, shape index: {}]   ;;  %s3758_s5 = inlined_call_operand.vmem [shape: bf16[128,128], index: 5, kind: input, shape index: {}]   ;;  %s3759_s6 = inlined_call_operand.vmem [shape: f32[5,128], index: 6, kind: input, shape index: {}]   ;;  %s3760_s7 = inlined_call_operand.vmem [shape: bf16[128,128], index: 7, kind: input, shape index: {}]   ;;  %s3761_s8 = inlined_call_operand.vmem [shape: f32[1,128], index: 8, kind: input, shape index: {}]   ;;  %s3762_s9 = inlined_call_operand.hbm [shape: bf16[128,128], index: 9, kind: output, shape index: {}]  }
   0x1   :  { %16 = vsyncpa [#allocation3 + $0x1], 0  ;;  %s2910_s30 = smov 0   ;;  %s2912_s10 = smov 0  }
   0x2   :  { %s2914_s11 = smov 0   ;;  %s2916_s12 = smov 0  }
   0x3 LB: > { %s2931_s13 = sadd.s32 4294967295, %s2854_s12   ;;  %s2241_s14 = sadd.s32 4294967294, %s2854_s12   ;;  %s2854_s12 = sphi %s2916_s12, %s3768_s12   ;;  %s2850_s11 = sphi %s2914_s11, %s3767_s11   ;;  %s2846_s10 = sphi %s2912_s10, %s3766_s10   ;;  %s2842_s30 = sphi %s2910_s30, %s3765_s30  }
   0x4   : > { %s2935_s15 = sadd.s32 1, %s2854_s12   ;;  %s223_s16 = sadd.s32 1, %s2850_s11 }
   0x5   : > { %s220_s17 = ssub.s32 %s2854_s12, %s2935_s15  ;;  %p233_p0 = scmp.ne.s32.totalorder %s2850_s11, %s2846_s10 }
   0x6   : > { %p221_p1 = scmp.eq.s32.totalorder %s220_s17, 0  ;;  %p234_p2 = scmp.eq.s32.totalorder %s2931_s13, 1 }
   0x7   : > { %p239_p3 = scmp.ne.s32.totalorder %s2846_s10, %s2842_s30  ;;  %p240_p4 = scmp.eq.s32.totalorder %s2241_s14, 1 }
   0x8   : > { %s2946_s18 = scalar_select %p221_p1, %s2850_s11, %s223_s16  }
   0x9   : > { %p2948_p5 = por %p234_p2, %p233_p0  ;;  %p2952_p6 = por %p240_p4, %p239_p3 }
   0xa   : > { %p2244_p7 = scmp.ge.s32.totalorder %s2854_s12, 1  ;;  %p292_p8 = scmp.lt.s32.totalorder %s2854_s12, 3 }
   0xc   : > { %p293_p9 = pnand %p2244_p7, %p292_p8 }
   0xd   : > { %s2246_s29 = sshll.u32 (!%p293_p9), %s2931_s13, 3  ;;  %s326_s21 = sand.u32 (!%p293_p9), 1, %s2846_s10  }
   0xe   : > { %296 = sbr.rel (%p293_p9) target bundleno = 1350 (0x546), region = 56  ;;  %p330_p10 = scmp.lt.s32.totalorder (!%p293_p9), %s2246_s29, 15 }
   0xf   : > { %s2245_s22 = sshll.u32 (!%p293_p9), %s326_s21, 5  ;;  %s2404_s24 = sshll.u32 (!%p293_p9), %s2931_s13, 9 }
  0x10   : > { %s328_s23 = scalar_lea.vmem (!%p293_p9), [#allocation2], %s2245_s22  ;;  %s3707_s26 = scalar_lea.hbm (!%p293_p9), %s3762_s9, %s2404_s24 }
  0x11   : > { %s3713_s13 = scalar_lea.sflag (!%p293_p9), [#allocation3], %s326_s21  ;;  %s2857_s27 = smov (!%p293_p9), [#allocation2]  }
  0x12   : > { %s2798_s16 = sshll.u32 (!%p293_p9), %s2857_s27, 4  ;;  %s2799_s16 = int_to_ptr.vmem [resolvable:$false] %s2798_s16 }
  0x13   : > { %v2583_v0 = vld [vmem:[%s3754_s1 + $0x74] ss:$8 sps:$4 sm:$0xff]   ;;  %v2585_v1 = vld [vmem:[%s3754_s1 + $0x70] ss:$8 sps:$4 sm:$0xff]   ;;  %v2589_v4 = vld [vmem:[%s3754_s1 + $0x64] ss:$8 sps:$4 sm:$0xff]  }
  0x14   : > { %1033 = vmatprep.subr.bf16.mxu0 %v2583_v0  ;;  %v2586_v2 = vld [vmem:[%s3754_s1 + $0x174] ss:$8 sps:$4 sm:$0xff]   ;;  %v2588_v3 = vld [vmem:[%s3754_s1 + $0x170] ss:$8 sps:$4 sm:$0xff]   ;;  %v2591_v5 = vld [vmem:[%s3754_s1 + $0x60] ss:$8 sps:$4 sm:$0xff]  }
  0x15   : > { %1034 = vmatpush1.bf16.msra.mxu0 %v2585_v1  ;;  %1106 = vmatprep.subr.bf16.mxu1 %v2586_v2  ;;  %v2592_v6 = vld [vmem:[%s3754_s1 + $0x164] ss:$8 sps:$4 sm:$0xff]   ;;  %v2594_v7 = vld [vmem:[%s3754_s1 + $0x160] ss:$8 sps:$4 sm:$0xff]   ;;  %v2595_v8 = vld [vmem:[%s3754_s1 + $0x54] ss:$8 sps:$4 sm:$0xff]  }
  0x16   : > { %1107 = vmatpush1.bf16.msra.mxu1 %v2588_v3  ;;  %1035 = vmatprep.subr.bf16.mxu0 %v2589_v4  ;;  %v2597_v9 = vld [vmem:[%s3754_s1 + $0x50] ss:$8 sps:$4 sm:$0xff]   ;;  %v2598_v10 = vld [vmem:[%s3754_s1 + $0x154] ss:$8 sps:$4 sm:$0xff]   ;;  %v2601_v11 = vld [vmem:[%s3754_s1 + $0x44] ss:$8 sps:$4 sm:$0xff]  }
  0x17   : > { %1108 = vmatprep.subr.bf16.mxu1 %v2592_v6  ;;  %v2600_v12 = vld [vmem:[%s3754_s1 + $0x150] ss:$8 sps:$4 sm:$0xff]   ;;  %v2604_v13 = vld [vmem:[%s3754_s1 + $0x144] ss:$8 sps:$4 sm:$0xff]   ;;  %v2603_v14 = vld [vmem:[%s3754_s1 + $0x40] ss:$8 sps:$4 sm:$0xff]  }
  0x18   : > { %v2607_v15 = vld [vmem:[%s3754_s1 + $0x34] ss:$8 sps:$4 sm:$0xff]   ;;  %v2606_v16 = vld [vmem:[%s3754_s1 + $0x140] ss:$8 sps:$4 sm:$0xff]   ;;  %v2609_v18 = vld [vmem:[%s3754_s1 + $0x30] ss:$8 sps:$4 sm:$0xff]  }
  0x19   : > { %1036 = vmatpush1.bf16.msra.mxu0 %v2591_v5  ;;  %v2610_v17 = vld [vmem:[%s3754_s1 + $0x134] ss:$8 sps:$4 sm:$0xff]   ;;  %v2613_v19 = vld [vmem:[%s3754_s1 + $0x24] ss:$8 sps:$4 sm:$0xff]   ;;  %v2612_v20 = vld [vmem:[%s3754_s1 + $0x130] ss:$8 sps:$4 sm:$0xff]  }
  0x1a   : > { %1037 = vmatprep.subr.bf16.mxu0 %v2595_v8  ;;  %1109 = vmatpush1.bf16.msra.mxu1 %v2594_v7  ;;  %v2616_v21 = vld [vmem:[%s3754_s1 + $0x124] ss:$8 sps:$4 sm:$0xff]   ;;  %v2615_v22 = vld [vmem:[%s3754_s1 + $0x20] ss:$8 sps:$4 sm:$0xff]   ;;  %v2619_v23 = vld [vmem:[%s3754_s1 + $0x14] ss:$8 sps:$4 sm:$0xff]  }
  0x1b   : > { %1110 = vmatprep.subr.bf16.mxu1 %v2598_v10  ;;  %v2618_v24 = vld [vmem:[%s3754_s1 + $0x120] ss:$8 sps:$4 sm:$0xff]   ;;  %v2622_v25 = vld [vmem:[%s3754_s1 + $0x114] ss:$8 sps:$4 sm:$0xff]   ;;  %v2621_v26 = vld [vmem:[%s3754_s1 + $0x10] ss:$8 sps:$4 sm:$0xff]  }
  0x1c   : > { %v2625_v27 = vld [vmem:[%s3754_s1 + $0x4] ss:$8 sps:$4 sm:$0xff]   ;;  %v2624_v28 = vld [vmem:[%s3754_s1 + $0x110] ss:$8 sps:$4 sm:$0xff]   ;;  %v2627_v30 = vld [vmem:[%s3754_s1] ss:$8 sps:$4 sm:$0xff]  }
  0x1d   : > { %1038 = vmatpush1.bf16.msra.mxu0 %v2597_v9  ;;  %v2628_v29 = vld [vmem:[%s3754_s1 + $0x104] ss:$8 sps:$4 sm:$0xff]   ;;  %v2631_v31 = vld [vmem:[%s3754_s1 + $0xf4] ss:$8 sps:$4 sm:$0xff]   ;;  %v2630_v32 = vld [vmem:[%s3754_s1 + $0x100] ss:$8 sps:$4 sm:$0xff]  }
  0x1e   : > { %1039 = vmatprep.subr.bf16.mxu0 %v2601_v11  ;;  %1111 = vmatpush1.bf16.msra.mxu1 %v2600_v12  ;;  %v2634_v33 = vld [vmem:[%s3754_s1 + $0x1f4] ss:$8 sps:$4 sm:$0xff]   ;;  %v2633_v34 = vld [vmem:[%s3754_s1 + $0xf0] ss:$8 sps:$4 sm:$0xff]   ;;  %s3770_s29 = smov (!%p330_p10, %s2246_s29), 15  ;;  %vm1020_vm0 = vcmask 130048  }
  0x1f   : > { %1112 = vmatprep.subr.bf16.mxu1 %v2604_v13  ;;  %v2637_v35 = vld [vmem:[%s3754_s1 + $0xe4] ss:$8 sps:$4 sm:$0xff]   ;;  %v2636_v36 = vld [vmem:[%s3754_s1 + $0x1f0] ss:$8 sps:$4 sm:$0xff]   ;;  %v2639_v38 = vld [vmem:[%s3754_s1 + $0xe0] ss:$8 sps:$4 sm:$0xff]  }
  0x20   : > { %v2640_v37 = vld [vmem:[%s3754_s1 + $0x1e4] ss:$8 sps:$4 sm:$0xff]   ;;  %s2540_s14 = smul.u32 56, %s3770_s29  ;;  %v2643_v39 = vld [vmem:[%s3754_s1 + $0xd4] ss:$8 sps:$4 sm:$0xff]   ;;  %s2800_s17 = scalar_lea.vmem %s2799_s16, 1024 }
  0x21   : > { %1040 = vmatpush1.bf16.msra.mxu0 %v2603_v14  ;;  %v2642_v40 = vld [vmem:[%s3754_s1 + $0x1e0] ss:$8 sps:$4 sm:$0xff]   ;;  %v2646_v41 = vld [vmem:[%s3754_s1 + $0x1d4] ss:$8 sps:$4 sm:$0xff]   ;;  %v2645_v42 = vld [vmem:[%s3754_s1 + $0xd0] ss:$8 sps:$4 sm:$0xff]  }
  0x22   : > { %1041 = vmatprep.subr.bf16.mxu0 %v2607_v15  ;;  %1113 = vmatpush1.bf16.msra.mxu1 %v2606_v16  ;;  %s3091_s28 = scalar_lea.vmem %s3753_s0, %s2540_s14  ;;  %v2649_v43 = vld [vmem:[%s3754_s1 + $0xc4] ss:$8 sps:$4 sm:$0xff]   ;;  %v2648_v44 = vld [vmem:[%s3754_s1 + $0x1d0] ss:$8 sps:$4 sm:$0xff]   ;;  %v2651_v48 = vld [vmem:[%s3754_s1 + $0xc0] ss:$8 sps:$4 sm:$0xff]  }
  0x23   : > { %1114 = vmatprep.subr.bf16.mxu1 %v2610_v17  ;;  %v2652_v45 = vld [vmem:[%s3754_s1 + $0x1c4] ss:$8 sps:$4 sm:$0xff]   ;;  %v2655_v50 = vld [vmem:[%s3754_s1 + $0xb4] ss:$8 sps:$4 sm:$0xff]   ;;  %v2654_v51 = vld [vmem:[%s3754_s1 + $0x1c0] ss:$8 sps:$4 sm:$0xff]  }
  0x24   : > { %v339_v46 = vld [vmem:[%s3091_s28 + $0x8] sm:$0xff]  ;;  %v346_v47 = vld [vmem:[%s3091_s28 + $0x40] sm:$0xff]  ;;  %v341_v52 = vld [vmem:[%s3091_s28 + $0x18] sm:$0xff]  ;;  %s2179_s14 = sshll.u32 %s328_s23, 4  ;;  %s3709_s14 = int_to_ptr.vmem [resolvable:$true] %s2179_s14 }
  0x25   : > { %1042 = vmatpush1.bf16.msra.mxu0 %v2609_v18  ;;  %v395_v49 = vpack.c.bf16 %v346_v47, %v339_v46  ;;  %v348_v53 = vld [vmem:[%s3091_s28 + $0x50] sm:$0xff]  ;;  %v2661_v57 = vld [vmem:[%s3754_s1 + $0xa4] ss:$8 sps:$4 sm:$0xff]   ;;  %v2663_v60 = vld [vmem:[%s3754_s1 + $0xa0] ss:$8 sps:$4 sm:$0xff]   ;;  %s2794_s29 = scalar_lea.vmem %s3709_s14, 512  ;;  %p2801_p0 = scmp.lt.s32.totalorder %s3709_s14, %s2799_s16 }
  0x26   : > { %1043 = vmatprep.subr.bf16.mxu0 %v2613_v19  ;;  %1115 = vmatpush1.bf16.msra.mxu1 %v2612_v20  ;;  %v2658_v54 = vld [vmem:[%s3754_s1 + $0x1b4] ss:$8 sps:$4 sm:$0xff]   ;;  %v397_v55 = vpack.c.bf16 %v348_v53, %v341_v52  ;;  %v2657_v56 = vld [vmem:[%s3754_s1 + $0xb0] ss:$8 sps:$4 sm:$0xff]   ;;  %v2664_v59 = vld [vmem:[%s3754_s1 + $0x1a4] ss:$8 sps:$4 sm:$0xff]   ;;  %p2795_p11 = scmp.ne.s32.totalorder %s3709_s14, %s2794_s29  ;;  %p2802_p1 = scmp.lt.s32.totalorder %s2800_s17, %s2794_s29 }
  0x27   : > { %1116 = vmatprep.subr.bf16.mxu1 %v2616_v21  ;;  %1065 = vmatprep.mubr.bf16.mxu0 %v395_v49  ;;  %v2660_v58 = vld [vmem:[%s3754_s1 + $0x1b0] ss:$8 sps:$4 sm:$0xff]   ;;  %v2667_v61 = vld [vmem:[%s3754_s1 + $0x94] ss:$8 sps:$4 sm:$0xff]   ;;  %v2666_v62 = vld [vmem:[%s3754_s1 + $0x1a0] ss:$8 sps:$4 sm:$0xff]  }
  0x28   : > { %1138 = vmatprep.mubr.bf16.mxu1 %v397_v55  ;;  %v2670_v63 = vld [vmem:[%s3754_s1 + $0x194] ss:$8 sps:$4 sm:$0xff]   ;;  %v2669_v0 = vld [vmem:[%s3754_s1 + $0x90] ss:$8 sps:$4 sm:$0xff]   ;;  %v2673_v1 = vld [vmem:[%s3754_s1 + $0x84] ss:$8 sps:$4 sm:$0xff]   ;;  %p2796_p12 = pnand %p2795_p11, %p2948_p5  ;;  %p2803_p2 = por %p2802_p1, %p2801_p0 }
  0x29   : > { %1044 = vmatpush1.bf16.msra.mxu0 %v2615_v22  ;;  %v2672_v2 = vld [vmem:[%s3754_s1 + $0x190] ss:$8 sps:$4 sm:$0xff]   ;;  %v2675_v3 = vld [vmem:[%s3754_s1 + $0x80] ss:$8 sps:$4 sm:$0xff]   ;;  %v2676_v4 = vld [vmem:[%s3754_s1 + $0x184] ss:$8 sps:$4 sm:$0xff]  }
  0x2a   : > { %1045 = vmatprep.subr.bf16.mxu0 %v2619_v23  ;;  %1117 = vmatpush1.bf16.msra.mxu1 %v2618_v24  ;;  %v338_v5 = vld [vmem:[%s3091_s28] sm:$0xff]  ;;  %v345_v7 = vld [vmem:[%s3091_s28 + $0x38] sm:$0xff]  ;;  %v340_v9 = vld [vmem:[%s3091_s28 + $0x10] sm:$0xff]  ;;  %p2797_p13 = pneg %p2796_p12 }
  0x2b   : > { %1118 = vmatprep.subr.bf16.mxu1 %v2622_v25  ;;  %v2678_v6 = vld [vmem:[%s3754_s1 + $0x180] ss:$8 sps:$4 sm:$0xff]   ;;  %v2681_v8 = vld [vmem:[%s3754_s1 + $0x274] ss:$8 sps:$4 sm:$0xff]   ;;  %v2708_v13 = vld [vmem:[%s3754_s1 + $0x304] ss:$8 sps:$4 sm:$0xff]   ;;  %v394_v14 = vpack.c.bf16 %v345_v7, %v338_v5 }
  0x2c   : > { %v347_v10 = vld [vmem:[%s3091_s28 + $0x48] sm:$0xff]  ;;  %v353_v11 = vld [vmem:[%s3091_s28 + $0x78] sm:$0xff]  ;;  %v360_v12 = vld [vmem:[%s3091_s28 + $0xb0] sm:$0xff]  ;;  %p2804_p3 = pnand %p2803_p2, %p2797_p13 }
  0x2d   : > { %1046 = vmatpush1.bf16.msra.mxu0 %v2621_v26  ;;  %v355_v15 = vld [vmem:[%s3091_s28 + $0x88] sm:$0xff]  ;;  %v362_v16 = vld [vmem:[%s3091_s28 + $0xc0] sm:$0xff]  ;;  %v2679_v17 = vld [vmem:[%s3754_s1 + $0x270] ss:$8 sps:$4 sm:$0xff]   ;;  %v402_v18 = vpack.c.bf16 %v360_v12, %v353_v11  ;;  %v396_v19 = vpack.c.bf16 %v347_v10, %v340_v9  ;;  %v2856_v9 = vmov 0  }
  0x2e   : > { %1047 = vmatprep.subr.bf16.mxu0 %v2625_v27  ;;  %1119 = vmatpush1.bf16.msra.mxu1 %v2624_v28  ;;  %v2684_v20 = vld [vmem:[%s3754_s1 + $0x264] ss:$8 sps:$4 sm:$0xff]   ;;  %v2682_v21 = vld [vmem:[%s3754_s1 + $0x260] ss:$8 sps:$4 sm:$0xff]   ;;  %v404_v23 = vpack.c.bf16 %v362_v16, %v355_v15  ;;  %v2687_v24 = vld [vmem:[%s3754_s1 + $0x254] ss:$8 sps:$4 sm:$0xff]  }
  0x2f   : > { %1120 = vmatprep.subr.bf16.mxu1 %v2628_v29  ;;  %v2706_v22 = vld [vmem:[%s3754_s1 + $0x300] ss:$8 sps:$4 sm:$0xff]   ;;  %v352_v25 = vld [vmem:[%s3091_s28 + $0x70] sm:$0xff]  ;;  %v2696_v52 = vld [vmem:[%s3754_s1 + $0x224] ss:$8 sps:$4 sm:$0xff]  }
  0x30   : > { %v359_v26 = vld [vmem:[%s3091_s28 + $0xa8] sm:$0xff]  ;;  %v374_v28 = vld [vmem:[%s3091_s28 + $0x120] sm:$0xff]  ;;  %v2705_v5 = vld [vmem:[%s3754_s1 + $0x2f4] ss:$8 sps:$4 sm:$0xff]  }
  0x31   : > { %1048 = vmatpush1.bf16.msra.mxu0 %v2627_v30  ;;  %v367_v27 = vld [vmem:[%s3091_s28 + $0xe8] sm:$0xff]  ;;  %v354_v29 = vld [vmem:[%s3091_s28 + $0x80] sm:$0xff]  ;;  %v361_v30 = vld [vmem:[%s3091_s28 + $0xb8] sm:$0xff] }
  0x32   : > { %1049 = vmatprep.subr.bf16.mxu0 %v2631_v31  ;;  %1121 = vmatpush1.bf16.msra.mxu1 %v2630_v32  ;;  %v401_v31 = vpack.c.bf16 %v359_v26, %v352_v25  ;;  %v369_v32 = vld [vmem:[%s3091_s28 + $0xf8] sm:$0xff]  ;;  %v375_v46 = vld [vmem:[%s3091_s28 + $0x128] sm:$0xff]  ;;  %v390_v49 = vld [vmem:[%s3091_s28 + $0x1a0] sm:$0xff] }
  0x33   : > { %1122 = vmatprep.subr.bf16.mxu1 %v2634_v33  ;;  %v376_v33 = vld [vmem:[%s3091_s28 + $0x130] sm:$0xff]  ;;  %v351_v7 = vld [vmem:[%s3091_s28 + $0x68] sm:$0xff]  ;;  %v365_v15 = vld [vmem:[%s3091_s28 + $0xd8] sm:$0xff] }
  0x34   : > { %v2711_v10 = vld [vmem:[%s3754_s1 + $0x2e4] ss:$8 sps:$4 sm:$0xff]   ;;  %v2709_v12 = vld [vmem:[%s3754_s1 + $0x2e0] ss:$8 sps:$4 sm:$0xff]   ;;  %v2712_v16 = vld [vmem:[%s3754_s1 + $0x2d0] ss:$8 sps:$4 sm:$0xff]  }
  0x35   : > { %1050 = vmatpush2.bf16.msra.mxu0 %v2633_v34  ;;  %v2685_v34 = vld [vmem:[%s3754_s1 + $0x250] ss:$8 sps:$4 sm:$0xff]   ;;  %v2721_v26 = vld [vmem:[%s3754_s1 + $0x2a0] ss:$8 sps:$4 sm:$0xff]  }
  0x36   : > { %1051 = vmatprep.subr.bf16.mxu0 %v2637_v35  ;;  %1123 = vmatpush2.bf16.msra.mxu1 %v2636_v36  ;;  %v409_v35 = vpack.c.bf16 %v374_v28, %v367_v27  ;;  %v2690_v36 = vld [vmem:[%s3754_s1 + $0x244] ss:$8 sps:$4 sm:$0xff]   ;;  %v2726_v27 = vld [vmem:[%s3754_s1 + $0x294] ss:$8 sps:$4 sm:$0xff]  }
  0x37   : > { %1124 = vmatprep.subr.bf16.mxu1 %v2640_v37  ;;  %v403_v37 = vpack.c.bf16 %v361_v30, %v354_v29  ;;  %v386_v28 = vld [vmem:[%s3091_s28 + $0x180] sm:$0xff]  ;;  %v393_v29 = vld [vmem:[%s3091_s28 + $0x1b8] sm:$0xff] }
  0x38   : > { %v2724_v30 = vld [vmem:[%s3754_s1 + $0x290] ss:$8 sps:$4 sm:$0xff]  }
  0x39   : > { %1052 = vmatpush2.bf16.msra.mxu0 %v2639_v38  ;;  %v411_v38 = vpack.c.bf16 %v376_v33, %v369_v32  ;;  %v421_v32 = vpack.c.bf16 %v393_v29, %v386_v28  ;;  %v2727_v33 = vld [vmem:[%s3754_s1 + $0x280] ss:$8 sps:$4 sm:$0xff]  }
  0x3a   : > { %1053 = vmatprep.subr.bf16.mxu0 %v2643_v39  ;;  %1125 = vmatpush2.bf16.msra.mxu1 %v2642_v40  ;;  %v2688_v39 = vld [vmem:[%s3754_s1 + $0x240] ss:$8 sps:$4 sm:$0xff]  }
  0x3b   : > { %1126 = vmatprep.subr.bf16.mxu1 %v2646_v41  ;;  %v366_v40 = vld [vmem:[%s3091_s28 + $0xe0] sm:$0xff]  ;;  %v373_v41 = vld [vmem:[%s3091_s28 + $0x118] sm:$0xff] }
  0x3c   : > { %v408_v47 = vpack.c.bf16 %v373_v41, %v366_v40  ;;  %v356_v40 = vld [vmem:[%s3091_s28 + $0x90] sm:$0xff]  ;;  %v363_v41 = vld [vmem:[%s3091_s28 + $0xc8] sm:$0xff] }
  0x3d   : > { %1054 = vmatpush2.bf16.msra.mxu0 %v2645_v42  ;;  %v2693_v42 = vld [vmem:[%s3754_s1 + $0x234] ss:$8 sps:$4 sm:$0xff]  }
  0x3e   : > { %1055 = vmatprep.subr.bf16.mxu0 %v2649_v43  ;;  %1127 = vmatpush2.bf16.msra.mxu1 %v2648_v44  ;;  %v381_v43 = vld [vmem:[%s3091_s28 + $0x158] sm:$0xff]  ;;  %v388_v44 = vld [vmem:[%s3091_s28 + $0x190] sm:$0xff] }
  0x3f   : > { %1128 = vmatprep.subr.bf16.mxu1 %v2652_v45  ;;  %v368_v45 = vld [vmem:[%s3091_s28 + $0xf0] sm:$0xff] }
  0x40   : > { %v410_v53 = vpack.c.bf16 %v375_v46, %v368_v45  ;;  %v370_v46 = vld [vmem:[%s3091_s28 + $0x100] sm:$0xff] }
  0x41   : > { %1056 = vmatpush2.bf16.msra.mxu0 %v2651_v48  ;;  %v383_v48 = vld [vmem:[%s3091_s28 + $0x168] sm:$0xff] }
  0x42   : > { %1057 = vmatprep.subr.bf16.mxu0 %v2655_v50  ;;  %1129 = vmatpush2.bf16.msra.mxu1 %v2654_v51  ;;  %v2691_v50 = vld [vmem:[%s3754_s1 + $0x230] ss:$8 sps:$4 sm:$0xff]   ;;  %v416_v51 = vpack.c.bf16 %v388_v44, %v381_v43  ;;  %v418_v55 = vpack.c.bf16 %v390_v49, %v383_v48  ;;  %v378_v43 = vld [vmem:[%s3091_s28 + $0x140] sm:$0xff]  ;;  %v405_v44 = vpack.c.bf16 %v363_v41, %v356_v40 }
  0x43   : > { %1130 = vmatprep.subr.bf16.mxu1 %v2658_v54  ;;  %v2694_v54 = vld [vmem:[%s3754_s1 + $0x220] ss:$8 sps:$4 sm:$0xff]   ;;  %v385_v48 = vld [vmem:[%s3091_s28 + $0x178] sm:$0xff]  ;;  %v392_v49 = vld [vmem:[%s3091_s28 + $0x1b0] sm:$0xff] }
  0x45   : > { %1058 = vmatpush2.bf16.msra.mxu0 %v2657_v56  ;;  %v2699_v56 = vld [vmem:[%s3754_s1 + $0x214] ss:$8 sps:$4 sm:$0xff]  }
  0x46   : > { %1059 = vmatprep.subr.bf16.mxu0 %v2661_v57  ;;  %1131 = vmatpush2.bf16.msra.mxu1 %v2660_v58  ;;  %v380_v57 = vld [vmem:[%s3091_s28 + $0x150] sm:$0xff]  ;;  %v387_v58 = vld [vmem:[%s3091_s28 + $0x188] sm:$0xff] }
  0x47   : > { %1132 = vmatprep.subr.bf16.mxu1 %v2664_v59  ;;  %v382_v59 = vld [vmem:[%s3091_s28 + $0x160] sm:$0xff] }
  0x49   : > { %1060 = vmatpush2.bf16.msra.mxu0 %v2663_v60  ;;  %v389_v60 = vld [vmem:[%s3091_s28 + $0x198] sm:$0xff] }
  0x4a   : > { %1061 = vmatprep.subr.bf16.mxu0 %v2667_v61  ;;  %1133 = vmatpush2.bf16.msra.mxu1 %v2666_v62  ;;  %v343_v61 = vld [vmem:[%s3091_s28 + $0x28] sm:$0xff]  ;;  %v350_v62 = vld [vmem:[%s3091_s28 + $0x60] sm:$0xff] }
  0x4b   : > { %1134 = vmatprep.subr.bf16.mxu1 %v2670_v63  ;;  %v2697_v63 = vld [vmem:[%s3754_s1 + $0x210] ss:$8 sps:$4 sm:$0xff]  }
  0x4d   : > { %1062 = vmatpush2.bf16.msra.mxu0 %v2669_v0  ;;  %v2702_v0 = vld [vmem:[%s3754_s1 + $0x204] ss:$8 sps:$4 sm:$0xff]  }
  0x4e   : > { %1063 = vmatprep.subr.bf16.mxu0 %v2673_v1  ;;  %1135 = vmatpush2.bf16.msra.mxu1 %v2672_v2  ;;  %v415_v1 = vpack.c.bf16 %v387_v58, %v380_v57  ;;  %v399_v2 = vpack.c.bf16 %v350_v62, %v343_v61  ;;  %v2732_v57 = vld [vmem:[%s3756_s3 + $0x70] sm:$0xff]   ;;  %v2736_v61 = vld [vmem:[%s3756_s3 + $0x60] sm:$0xff]  }
  0x4f   : > { %1136 = vmatprep.subr.bf16.mxu1 %v2676_v4  ;;  %v2700_v4 = vld [vmem:[%s3754_s1 + $0x200] ss:$8 sps:$4 sm:$0xff]   ;;  %v2733_v58 = vld [vmem:[%s3756_s3 + $0x30] sm:$0xff]  }
  0x50   : > { %v2737_v62 = vld [vmem:[%s3756_s3 + $0x20] sm:$0xff]  }
  0x51   : > { %1064 = vmatpush2.bf16.msra.mxu0 %v2675_v3  ;;  %v417_v3 = vpack.c.bf16 %v389_v60, %v382_v59  ;;  %v2734_v59 = vld [vmem:[%s3756_s3 + $0x68] sm:$0xff]  }
  0x52   : > { %1179 = vmatprep.subr.bf16.mxu0 %v2681_v8  ;;  %1137 = vmatpush2.bf16.msra.mxu1 %v2678_v6  ;;  %v344_v6 = vld [vmem:[%s3091_s28 + $0x30] sm:$0xff]  ;;  %v2735_v60 = vld [vmem:[%s3756_s3 + $0x28] sm:$0xff]  }
  0x53   : > { %1266 = vmatprep.subr.bf16.mxu1 %v2708_v13  ;;  %v2703_v8 = vld [vmem:[%s3754_s1 + $0x2f0] ss:$8 sps:$4 sm:$0xff]   ;;  %v400_v11 = vpack.c.bf16 %v351_v7, %v344_v6  ;;  %v2714_v13 = vld [vmem:[%s3754_s1 + $0x2d4] ss:$8 sps:$4 sm:$0xff]   ;;  %v2745_v6 = vld [vmem:[%s3756_s3] sm:$0xff]  }
  0x54   : > { %1066 = vmatmul.mubr.bf16.vlgmr.msra.gmra.mxu0 %v394_v14  ;;  %v358_v14 = vld [vmem:[%s3091_s28 + $0xa0] sm:$0xff]  ;;  %v2746_v7 = vld [vmem:[%s3758_s5 + $0x38] sm:$0xff]  }
  0x55   : > { %1180 = vmatpush1.bf16.msra.mxu0 %v2679_v17  ;;  %1075 = vmatprep.mubr.bf16.mxu0 %v402_v18  ;;  %v2717_v17 = vld [vmem:[%s3754_s1 + $0x2c4] ss:$8 sps:$4 sm:$0xff]   ;;  %v407_v18 = vpack.c.bf16 %v365_v15, %v358_v14 }
  0x56   : > { %1139 = vmatmul.mubr.bf16.vlgmr.msra.gmra.mxu1 %v396_v19  ;;  %1181 = vmatprep.subr.bf16.mxu0 %v2684_v20  ;;  %v2715_v19 = vld [vmem:[%s3754_s1 + $0x2c0] ss:$8 sps:$4 sm:$0xff]   ;;  %v2720_v20 = vld [vmem:[%s3754_s1 + $0x2b4] ss:$8 sps:$4 sm:$0xff]  }
  0x57   : > { %1267 = vmatpush1.bf16.msra.mxu1 %v2706_v22  ;;  %1148 = vmatprep.mubr.bf16.mxu1 %v404_v23  ;;  %v379_v22 = vld [vmem:[%s3091_s28 + $0x148] sm:$0xff]  ;;  %v2718_v23 = vld [vmem:[%s3754_s1 + $0x2b0] ss:$8 sps:$4 sm:$0xff]  }
  0x59   : > { %1182 = vmatpush1.bf16.msra.mxu0 %v2682_v21  ;;  %v372_v21 = vld [vmem:[%s3091_s28 + $0x110] sm:$0xff] }
  0x5a   : > { %1183 = vmatprep.subr.bf16.mxu0 %v2687_v24  ;;  %v2723_v24 = vld [vmem:[%s3754_s1 + $0x2a4] ss:$8 sps:$4 sm:$0xff]   ;;  %v414_v25 = vpack.c.bf16 %v379_v22, %v372_v21 }
  0x5c   : > { %1076 = vmatmul.mubr.bf16.gmra.mxu0 %v401_v31  ;;  %v2729_v31 = vld [vmem:[%s3754_s1 + $0x284] ss:$8 sps:$4 sm:$0xff]  }
  0x5d   : > { %1184 = vmatpush1.bf16.msra.mxu0 %v2685_v34  ;;  %1085 = vmatprep.mubr.bf16.mxu0 %v409_v35  ;;  %v342_v34 = vld [vmem:[%s3091_s28 + $0x20] sm:$0xff]  ;;  %v349_v35 = vld [vmem:[%s3091_s28 + $0x58] sm:$0xff] }
  0x5e   : > { %1185 = vmatprep.subr.bf16.mxu0 %v2690_v36  ;;  %1149 = vmatmul.mubr.bf16.gmra.mxu1 %v403_v37  ;;  %v357_v36 = vld [vmem:[%s3091_s28 + $0x98] sm:$0xff]  ;;  %v364_v37 = vld [vmem:[%s3091_s28 + $0xd0] sm:$0xff] }
  0x5f   : > { %1158 = vmatprep.mubr.bf16.mxu1 %v411_v38  ;;  %v398_v38 = vpack.c.bf16 %v349_v35, %v342_v34 }
  0x61   : > { %1186 = vmatpush1.bf16.msra.mxu0 %v2688_v39  ;;  %v406_v39 = vpack.c.bf16 %v364_v37, %v357_v36 }
  0x62   : > { %1187 = vmatprep.subr.bf16.mxu0 %v2693_v42  ;;  %v371_v42 = vld [vmem:[%s3091_s28 + $0x108] sm:$0xff] }
  0x63   : > { %v413_v45 = vpack.c.bf16 %v378_v43, %v371_v42 }
  0x64   : > { %1086 = vmatmul.mubr.bf16.gmra.mxu0 %v408_v47  ;;  %v377_v47 = vld [vmem:[%s3091_s28 + $0x138] sm:$0xff] }
  0x65   : > { %1188 = vmatpush1.bf16.msra.mxu0 %v2691_v50  ;;  %1095 = vmatprep.mubr.bf16.mxu0 %v416_v51  ;;  %v412_v50 = vpack.c.bf16 %v377_v47, %v370_v46  ;;  %v420_v51 = vpack.c.bf16 %v392_v49, %v385_v48  ;;  %v422_v46 = vld [vmem:[%s3755_s2] sm:$0x1f]  ;;  %v423_v49 = vld [vmem:[%s3755_s2 + $0x8] sm:$0x1f] }
  0x66   : > { %1189 = vmatprep.subr.bf16.mxu0 %v2696_v52  ;;  %1159 = vmatmul.mubr.bf16.gmra.mxu1 %v410_v53  ;;  %v384_v52 = vld [vmem:[%s3091_s28 + $0x170] sm:$0xff]  ;;  %v391_v53 = vld [vmem:[%s3091_s28 + $0x1a8] sm:$0xff]  ;;  %v1333_v48 = vpack.c.bf16 %v422_v46, %v422_v46 }
  0x67   : > { %1168 = vmatprep.mubr.bf16.mxu1 %v418_v55  ;;  %v2730_v55 = vld [vmem:[%s3756_s3 + $0x78] sm:$0xff]  }
  0x68   : > { %2428 = vmatprep.subr.bf16.mxu1 %v2730_v55  ;;  %v1344_v55 = vshrl.u32 %v1333_v48, 16 }
  0x69   : > { %1190 = vmatpush1.bf16.msra.mxu0 %v2694_v54  ;;  %v419_v54 = vpack.c.bf16 %v391_v53, %v384_v52  ;;  %v1334_v52 = vpack.c.bf16 %v423_v49, %v423_v49 }
  0x6a   : > { %1191 = vmatprep.subr.bf16.mxu0 %v2699_v56  ;;  %v2731_v56 = vld [vmem:[%s3756_s3 + $0x38] sm:$0xff]  }
  0x6c   : > { %1096 = vmatmul.mubr.bf16.gmra.mxu0 %v415_v1  ;;  %v2740_v1 = vld [vmem:[%s3756_s3 + $0x50] sm:$0xff]  }
  0x6d   : > { %1192 = vmatpush1.bf16.msra.mxu0 %v2697_v63  ;;  %1211 = vmatprep.mubr.bf16.mxu0 %v399_v2  ;;  %v2738_v63 = vld [vmem:[%s3756_s3 + $0x58] sm:$0xff]   ;;  %v2741_v2 = vld [vmem:[%s3756_s3 + $0x10] sm:$0xff]  }
  0x6e   : > { %1193 = vmatprep.subr.bf16.mxu0 %v2702_v0  ;;  %1169 = vmatmul.mubr.bf16.gmra.mxu1 %v417_v3  ;;  %v2739_v0 = vld [vmem:[%s3756_s3 + $0x18] sm:$0xff]   ;;  %v2742_v3 = vld [vmem:[%s3756_s3 + $0x48] sm:$0xff]  }
  0x6f   : > { %1284 = vmatprep.mubr.bf16.mxu1 %v2856_v9 }
  0x71   : > { %1194 = vmatpush1.bf16.msra.mxu0 %v2700_v4  ;;  %v2743_v4 = vld [vmem:[%s3756_s3 + $0x8] sm:$0xff]  }
  0x72   : > { %1195 = vmatprep.subr.bf16.mxu0 %v2705_v5  ;;  %v2744_v5 = vld [vmem:[%s3756_s3 + $0x40] sm:$0xff]  }
  0x75   : > { %1196 = vmatpush2.bf16.msra.mxu0 %v2703_v8 }
  0x76   : > { %1197 = vmatprep.subr.bf16.mxu0 %v2711_v10  ;;  %2346 = vmatmul.mubr.msk.bf16.vlgmr.msra.gmra.mxu1 %vm1020_vm0, %v400_v11 }
  0x77   : > { %1294 = vmatprep.mubr.bf16.mxu1 %v2856_v9  ;;  %2429 = vmatpush3.bf16.msra.mxu1 %v2731_v56 }
  0x78   : > { %2430 = vmatprep.subr.bf16.mxu1 %v2732_v57 }
  0x79   : > { %1198 = vmatpush2.bf16.msra.mxu0 %v2709_v12 }
  0x7a   : > { %1199 = vmatprep.subr.bf16.mxu0 %v2714_v13 }
  0x7b   : > { %2431 = vmatpush3.bf16.msra.mxu1 %v2733_v58  ;;  %v1352_v58 = vshrl.u32 %v1334_v52, 16 }
  0x7c   : > { %2432 = vmatprep.subr.bf16.mxu1 %v2734_v59 }
  0x7d   : > { %1200 = vmatpush2.bf16.msra.mxu0 %v2712_v16 }
  0x7e   : > { %1201 = vmatprep.subr.bf16.mxu0 %v2717_v17  ;;  %2347 = vmatmul.mubr.msk.bf16.gmra.mxu1 %vm1020_vm0, %v407_v18 }
  0x7f   : > { %1304 = vmatprep.mubr.bf16.mxu1 %v2856_v9  ;;  %2433 = vmatpush3.bf16.msra.mxu1 %v2735_v60 }
  0x80   : > { %2434 = vmatprep.subr.bf16.mxu1 %v2736_v61 }
  0x81   : > { %1202 = vmatpush2.bf16.msra.mxu0 %v2715_v19 }
  0x82   : > { %1203 = vmatprep.subr.bf16.mxu0 %v2720_v20 }
  0x83   : > { %2435 = vmatpush3.bf16.msra.mxu1 %v2737_v62  ;;  %v1345_v62 = vpack.i.b16 %v1344_v55, %v1344_v55 }
  0x84   : > { %2436 = vmatprep.subr.bf16.mxu1 %v2738_v63 }
  0x85   : > { %1204 = vmatpush2.bf16.msra.mxu0 %v2718_v23 }
  0x86   : > { %1205 = vmatprep.subr.bf16.mxu0 %v2723_v24  ;;  %2348 = vmatmul.mubr.msk.bf16.gmra.mxu1 %vm1020_vm0, %v414_v25 }
  0x87   : > { %1314 = vmatprep.mubr.bf16.mxu1 %v2856_v9  ;;  %2437 = vmatpush3.bf16.msra.mxu1 %v2739_v0 }
  0x88   : > { %2438 = vmatprep.subr.bf16.mxu1 %v2740_v1  ;;  %v1399_v1 = vpack.i.b16 %v1333_v48, %v1333_v48 }
  0x89   : > { %1206 = vmatpush2.bf16.msra.mxu0 %v2721_v26 }
  0x8a   : > { %1207 = vmatprep.subr.bf16.mxu0 %v2726_v27 }
  0x8b   : > { %2439 = vmatpush3.bf16.msra.mxu1 %v2741_v2 }
  0x8c   : > { %2440 = vmatprep.subr.bf16.mxu1 %v2742_v3  ;;  %v1405_v3 = vpack.i.b16 %v1334_v52, %v1334_v52 }
  0x8d   : > { %1208 = vmatpush2.bf16.msra.mxu0 %v2724_v30 }
  0x8e   : > { %1209 = vmatprep.subr.bf16.mxu0 %v2729_v31  ;;  %2349 = vmatmul.mubr.msk.bf16.gmra.mxu1 %vm1020_vm0, %v421_v32 }
  0x8f   : > { %2441 = vmatpush3.bf16.msra.mxu1 %v2743_v4 }
  0x90   : > { %2442 = vmatprep.subr.bf16.mxu1 %v2744_v5 }
  0x91   : > { %1210 = vmatpush2.bf16.msra.mxu0 %v2727_v33 }
  0x92   : > { %2492 = vmatprep.subr.bf16.mxu0 %v2746_v7 }
  0x93   : > { %2443 = vmatpush3.bf16.msra.mxu1 %v2745_v6 }
  0x94   : > { %1212 = vmatmul.mubr.bf16.vlgmr.msra.gmra.mxu0 %v398_v38 }
  0x95   : > { %1221 = vmatprep.mubr.bf16.mxu0 %v406_v39  ;;  %2493 = vmatpush3.bf16.msra.mxu0 %v2746_v7  ;;  %v522_v39 = vlaneseq  ;;  %v1353_v7 = vpack.i.b16 %v1352_v58, %v1352_v58 }
  0x97   : > { %v523_v42 = vshrl.u32 %v522_v39, 7 }
  0x99   : > { %v3438_v0 = vsub.s32 1, %v523_v42  ;;  %v3440_v2 = vsub.s32 2, %v523_v42 }
  0x9b   : > { %v3449_v55 = vrot.slane %v1399_v1, %v3440_v2 }
  0x9c   : > { %1222 = vmatmul.mubr.bf16.gmra.mxu0 %v405_v44 }
  0x9d   : > { %1231 = vmatprep.mubr.bf16.mxu0 %v413_v45  ;;  %v3411_v45 = vsub.s32 0, %v523_v42  ;;  %v3452_v42 = vrot.slane %v1405_v3, %v3440_v2 }
  0xa4   : > { %1232 = vmatmul.mubr.bf16.gmra.mxu0 %v412_v50 }
  0xa5   : > { %1241 = vmatprep.mubr.bf16.mxu0 %v420_v51  ;;  %v3424_v51 = vrot.slane %v422_v46, %v3411_v45 }
  0xac   : > { %1242 = vmatmul.mubr.bf16.gmra.mxu0 %v419_v54  ;;  %v3429_v54 = vrot.slane %v423_v49, %v3411_v45 }
 0x114   : > { %v1067_v10 = vpop.f32.mrf.mxu0 }
 0x115   : > { %v1068_v57 = vadd.f32 %v1067_v10, %v3424_v51 }
 0x116   : > { %v1140_v8 = vpop.f32.mrf.mxu1  ;;  %v1069_v13 = vpop.f32.mrf.mxu0 }
 0x117   : > { %v1070_v60 = vadd.f32 %v1069_v13, %v3429_v54  ;;  %v1141_v5 = vadd.f32 %v1140_v8, %v1068_v57 }
 0x118   : > { %v1142_v11 = vpop.f32.mrf.mxu1  ;;  %v1071_v16 = vpop.f32.mrf.mxu0 }
 0x119   : > { %v1072_v61 = vadd.f32 %v1071_v16, %v3424_v51  ;;  %v1143_v39 = vadd.f32 %v1142_v11, %v1070_v60  ;;  %v3446_v16 = vrot.slane %v1345_v62, %v3438_v0  ;;  %v3458_v11 = vrot.slane %v1353_v7, %v3438_v0 }
 0x11a   : > { %v1144_v12 = vpop.f32.mrf.mxu1  ;;  %v1073_v19 = vpop.f32.mrf.mxu0  ;;  %v3465_v60 = vrot.slane %v1345_v62, %v3411_v45 }
 0x11b   : > { %v1074_v6 = vadd.f32 %v1073_v19, %v3429_v54  ;;  %v1145_v46 = vadd.f32 %v1144_v12, %v1072_v61 }
 0x11c   : > { %v3373_v14 = vpop.f32.mrf.mxu1  ;;  %v3383_v21 = vpop.f32.mrf.mxu0 }
 0x11d   : > { %v1147_v8 = vadd.f32 %v3373_v14, %v1074_v6  ;;  %v1078_v12 = vadd.f32 %v3383_v21, %v3424_v51 }
 0x11e   : > { %v3375_v15 = vpop.f32.mrf.mxu1  ;;  %v1079_v24 = vpop.f32.mrf.mxu0 }
 0x11f   : > { %v1080_v57 = vadd.f32 %v1079_v24, %v3429_v54 }
 0x120   : > { %v3377_v17 = vpop.f32.mrf.mxu1  ;;  %v1081_v27 = vpop.f32.mrf.mxu0 }
 0x121   : > { %v1082_v58 = vadd.f32 %v1081_v27, %v3424_v51  ;;  %v3476_v27 = vrot.slane %v1353_v7, %v3411_v45 }
 0x122   : > { %v3379_v18 = vpop.f32.mrf.mxu1  ;;  %v1083_v30 = vpop.f32.mrf.mxu0 }
 0x123   : > { %v1155_v7 = vadd.f32 %v3379_v18, %v1082_v58 }
 0x124   : > { %v3381_v20 = vpop.f32.mrf.mxu1  ;;  %v1087_v33 = vpop.f32.mrf.mxu0 }
 0x126   : > { %v3385_v22 = vpop.f32.mrf.mxu1  ;;  %v1089_v35 = vpop.f32.mrf.mxu0 }
 0x128   : > { %v3387_v23 = vpop.f32.mrf.mxu1  ;;  %v3403_v37 = vpop.f32.mrf.mxu0 }
 0x12a   : > { %v3389_v25 = vpop.f32.mrf.mxu1  ;;  %v3405_v40 = vpop.f32.mrf.mxu0 }
 0x12c   : > { %v3391_v26 = vpop.f32.mrf.mxu1  ;;  %v3407_v43 = vpop.f32.mrf.mxu0 }
 0x12d   : > { %v1098_v58 = vadd.f32 %v3407_v43, %v3424_v51 }
 0x12e   : > { %v3393_v28 = vpop.f32.mrf.mxu1  ;;  %v3416_v47 = vpop.f32.mrf.mxu0 }
 0x130   : > { %v3395_v29 = vpop.f32.mrf.mxu1  ;;  %v3426_v53 = vpop.f32.mrf.mxu0 }
 0x132   : > { %v3397_v31 = vpop.f32.mrf.mxu1  ;;  %v3434_v59 = vpop.f32.mrf.mxu0 }
 0x134   : > { %v3399_v32 = vpop.f32.mrf.mxu1 }
 0x136   : > { %v1286_v34 = vpop.f32.mrf.mxu1 }
 0x138   : > { %v3401_v36 = vpop.f32.mrf.mxu1 }
 0x13a   : > { %v1290_v38 = vpop.f32.mrf.mxu1 }
 0x13c   : > { %v1292_v41 = vpop.f32.mrf.mxu1 }
 0x13e   : > { %v3409_v44 = vpop.f32.mrf.mxu1 }
 0x140   : > { %v3421_v50 = vpop.f32.mrf.mxu1 }
 0x142   : > { %v3431_v56 = vpop.f32.mrf.mxu1 }
 0x144   : > { %v3442_v4 = vpop.f32.mrf.mxu1 }
 0x146   : > { %v3454_v48 = vpop.f32.mrf.mxu1 }
 0x148   : > { %v3473_v24 = vpop.f32.mrf.mxu1 }
 0x154   : > { %v1213_v63 = vpop.f32.mrf.mxu0 }
 0x155   : > { %v1214_v13 = vadd.f32 %v1213_v63, %v1141_v5  ;;  %v1084_v63 = vadd.f32 %v1083_v30, %v3429_v54 }
 0x156   : > { %v1215_v10 = vpop.f32.mrf.mxu0 }
 0x157   : > { %v1216_v19 = vadd.f32 %v1215_v10, %v1143_v39  ;;  %v1287_v5 = vadd.f32 %v1286_v34, %v1214_v13  ;;  %v1088_v10 = vadd.f32 %v1087_v33, %v3424_v51  ;;  %v1090_v39 = vadd.f32 %v1089_v35, %v3429_v54 }
 0x158   : > { %v1217_v49 = vpop.f32.mrf.mxu0  ;;  %v3480_v34 = vrot.slane %v1405_v3, %v3438_v0  ;;  %v1151_v33 = vadd.f32 %v3375_v15, %v1078_v12  ;;  %v1153_v35 = vadd.f32 %v3377_v17, %v1080_v57 }
 0x159   : > { %v1218_v52 = vadd.f32 %v1217_v49, %v1145_v46  ;;  %v3471_v46 = vrot.slane %v1399_v1, %v3438_v0  ;;  %v1289_v62 = vadd.f32 %v3401_v36, %v1216_v19  ;;  %v1094_v1 = vadd.f32 %v3405_v40, %v3429_v54 }
 0x15a   : > { %v1219_v61 = vpop.f32.mrf.mxu0  ;;  %v1157_v36 = vadd.f32 %v3381_v20, %v1084_v63  ;;  %v1161_v3 = vadd.f32 %v3385_v22, %v1088_v10  ;;  %v1163_v15 = vadd.f32 %v3387_v23, %v1090_v39 }
 0x15b   : > { %v1291_v14 = vadd.f32 %v1290_v38, %v1218_v52  ;;  %v1220_v6 = vadd.f32 %v1219_v61, %v1147_v8  ;;  %v1092_v38 = vadd.f32 %v3403_v37, %v3424_v51  ;;  %v1310_v37 = vpop.f32.mrf.mxu1  ;;  %v1167_v22 = vadd.f32 %v3391_v26, %v1094_v1 }
 0x15c   : > { %v1223_v21 = vpop.f32.mrf.mxu0 }
 0x15d   : > { %v1325_v49 = vpack.c.bf16 %v1291_v14, %v1287_v5  ;;  %v1293_v30 = vadd.f32 %v1292_v41, %v1220_v6  ;;  %v1224_v19 = vadd.f32 %v1223_v21, %v1151_v33  ;;  %v1165_v20 = vadd.f32 %v3389_v25, %v1092_v38 }
 0x15e   : > { %v1225_v13 = vpop.f32.mrf.mxu0  ;;  %v1171_v38 = vadd.f32 %v3393_v28, %v1098_v58 }
 0x15f   : > { %v1359_v41 = vsub.bf16 %v3446_v16, %v1325_v49  ;;  %v1326_v8 = vpack.c.bf16 %v1293_v30, %v1289_v62  ;;  %v1411_v17 = vsub.bf16 %v3449_v55, %v1325_v49  ;;  %v1226_v57 = vadd.f32 %v1225_v13, %v1153_v35  ;;  %v1312_v62 = vpop.f32.mrf.mxu1 }
 0x160   : > { %v1227_v52 = vpop.f32.mrf.mxu0  ;;  %v1335_v63 = vmax.bf16 %v2856_v9, %v1325_v49  ;;  %v1297_v39 = vadd.f32 %v3409_v44, %v1224_v19  ;;  %v1100_v35 = vadd.f32 %v3416_v47, %v3429_v54  ;;  %v1102_v13 = vadd.f32 %v3426_v53, %v3424_v51 }
 0x161   : > { %v1367_v12 = vmax.bf16 %v2856_v9, %v1359_v41  ;;  %v1360_v40 = vsub.bf16 %v3458_v11, %v1326_v8  ;;  %v1412_v18 = vsub.bf16 %v3452_v42, %v1326_v8  ;;  %v1228_v23 = vadd.f32 %v1227_v52, %v1155_v7  ;;  %v1316_v19 = vpop.f32.mrf.mxu1 }
 0x162   : > { %v1229_v61 = vpop.f32.mrf.mxu0  ;;  %v1419_v10 = vmax.bf16 %v2856_v9, %v1411_v17  ;;  %v1299_v26 = vadd.f32 %v3421_v50, %v1226_v57  ;;  %v1336_v49 = vmax.bf16 %v2856_v9, %v1326_v8  ;;  %v1104_v51 = vadd.f32 %v3434_v59, %v3429_v54 }
 0x163   : > { %v1383_v5 = vmul.bf16 %v3465_v60, %v1367_v12  ;;  %v1230_v14 = vadd.f32 %v1229_v61, %v1157_v36  ;;  %v1368_v6 = vmax.bf16 %v2856_v9, %v1360_v40  ;;  %v1301_v25 = vadd.f32 %v3431_v56, %v1228_v23 }
 0x164   : > { %v1233_v21 = vpop.f32.mrf.mxu0  ;;  %v1420_v43 = vmax.bf16 %v2856_v9, %v1412_v18 }
 0x165   : > { %v1303_v30 = vadd.f32 %v3442_v4, %v1230_v14  ;;  %v1384_v33 = vmul.bf16 %v3476_v27, %v1368_v6  ;;  %v1327_v44 = vpack.c.bf16 %v1301_v25, %v1297_v39  ;;  %v1234_v1 = vadd.f32 %v1233_v21, %v1161_v3 }
 0x166   : > { %v1235_v56 = vpop.f32.mrf.mxu0  ;;  %v1391_v7 = vadd.bf16 %v1383_v5, %v1335_v63  ;;  %v1435_v4 = vmul.bf16 %v3471_v46, %v1419_v10  ;;  %v1436_v47 = vmul.bf16 %v3480_v34, %v1420_v43  ;;  %v1318_v5 = vpop.f32.mrf.mxu1 }
 0x167   : > { %v1328_v36 = vpack.c.bf16 %v1303_v30, %v1299_v26  ;;  %v1392_v50 = vadd.bf16 %v1384_v33, %v1336_v49  ;;  %v1361_v41 = vsub.bf16 %v3446_v16, %v1327_v44  ;;  %v1413_v8 = vsub.bf16 %v3449_v55, %v1327_v44 }
 0x168   : > { %v1237_v17 = vpop.f32.mrf.mxu0  ;;  %v1236_v52 = vadd.f32 %v1235_v56, %v1163_v15  ;;  %v1307_v53 = vadd.f32 %v3454_v48, %v1234_v1  ;;  %v1443_v61 = vadd.bf16 %v1435_v4, %v1391_v7  ;;  %v1175_v26 = vadd.f32 %v3397_v31, %v1102_v13 }
 0x169   : > { %v1362_v28 = vsub.bf16 %v3458_v11, %v1328_v36  ;;  %v1414_v3 = vsub.bf16 %v3452_v42, %v1328_v36  ;;  %v1238_v12 = vadd.f32 %v1237_v17, %v1165_v20  ;;  %v1444_v18 = vadd.bf16 %v1436_v47, %v1392_v50 }
 0x16a   : > { %v1239_v40 = vpop.f32.mrf.mxu0  ;;  %v1369_v57 = vmax.bf16 %v2856_v9, %v1361_v41  ;;  %v1337_v20 = vmax.bf16 %v2856_v9, %v1327_v44  ;;  %v1421_v59 = vmax.bf16 %v2856_v9, %v1413_v8  ;;  %v1309_v48 = vadd.f32 %v3473_v24, %v1236_v52 }
 0x16b   : > { %v1311_v58 = vadd.f32 %v1310_v37, %v1238_v12  ;;  %v1240_v23 = vadd.f32 %v1239_v40, %v1167_v22  ;;  %v1370_v63 = vmax.bf16 %v2856_v9, %v1362_v28  ;;  %1616 = vmatprep.mubr.bf16.mxu1 %v1444_v18  ;;  %v1422_v15 = vmax.bf16 %v2856_v9, %v1414_v3 }
 0x16c   : > { %v1243_v14 = vpop.f32.mrf.mxu0  ;;  %v1385_v54 = vmul.bf16 %v3465_v60, %v1369_v57  ;;  %1617 = vmatmul.mubr.bf16.vlgmr.msra.gmra.mxu1 %v1443_v61  ;;  %v1173_v22 = vadd.f32 %v3395_v29, %v1100_v35  ;;  %v1338_v21 = vmax.bf16 %v2856_v9, %v1328_v36  ;;  %v1177_v30 = vadd.f32 %v3399_v32, %v1104_v51 }
 0x16d   : > { %v1329_v6 = vpack.c.bf16 %v1311_v58, %v1307_v53  ;;  %v1313_v10 = vadd.f32 %v1312_v62, %v1240_v23  ;;  %v1386_v37 = vmul.bf16 %v3476_v27, %v1370_v63  ;;  %v1244_v39 = vadd.f32 %v1243_v14, %v1171_v38  ;;  %v1320_v62 = vpop.f32.mrf.mxu1 }
 0x16e   : > { %v1245_v25 = vpop.f32.mrf.mxu0  ;;  %v1393_v43 = vadd.bf16 %v1385_v54, %v1337_v20  ;;  %v1438_v56 = vmul.bf16 %v3480_v34, %v1422_v15  ;;  %v1437_v29 = vmul.bf16 %v3471_v46, %v1421_v59 }
 0x16f   : > { %v1363_v49 = vsub.bf16 %v3446_v16, %v1329_v6  ;;  %v1330_v33 = vpack.c.bf16 %v1313_v10, %v1309_v48  ;;  %v1415_v24 = vsub.bf16 %v3449_v55, %v1329_v6  ;;  %v1394_v1 = vadd.bf16 %v1386_v37, %v1338_v21  ;;  %v1322_v28 = vpop.f32.mrf.mxu1 }
 0x170   : > { %v1247_v44 = vpop.f32.mrf.mxu0  ;;  %v1246_v7 = vadd.f32 %v1245_v25, %v1173_v22  ;;  %v1317_v13 = vadd.f32 %v1316_v19, %v1244_v39  ;;  %v1445_v50 = vadd.bf16 %v1437_v29, %v1393_v43  ;;  %v1339_v52 = vmax.bf16 %v2856_v9, %v1329_v6 }
 0x171   : > { %v1364_v35 = vsub.bf16 %v3458_v11, %v1330_v33  ;;  %v1416_v38 = vsub.bf16 %v3452_v42, %v1330_v33  ;;  %v1248_v31 = vadd.f32 %v1247_v44, %v1175_v26  ;;  %v1446_v36 = vadd.bf16 %v1438_v56, %v1394_v1  ;;  %v2756_v44 = vld [vmem:[%s3760_s7 + $0x28] sm:$0xff]   ;;  %v1451_v1 = vld [vmem:[%s3757_s4] sm:$0x1f] }
 0x172   : > { %v1249_v32 = vpop.f32.mrf.mxu0  ;;  %v1371_v4 = vmax.bf16 %v2856_v9, %v1363_v49  ;;  %v1340_v3 = vmax.bf16 %v2856_v9, %v1330_v33  ;;  %v1423_v19 = vmax.bf16 %v2856_v9, %v1415_v24  ;;  %v1319_v51 = vadd.f32 %v1318_v5, %v1246_v7  ;;  %v2752_v49 = vld [vmem:[%s3758_s5 + $0x8] sm:$0xff]   ;;  %v2753_v33 = vld [vmem:[%s3758_s5] sm:$0xff]   ;;  %v2754_v24 = vld [vmem:[%s3760_s7 + $0x38] sm:$0xff]  }
 0x173   : > { %v1321_v41 = vadd.f32 %v1320_v62, %v1248_v31  ;;  %v1250_v8 = vadd.f32 %v1249_v32, %v1177_v30  ;;  %v1372_v17 = vmax.bf16 %v2856_v9, %v1364_v35  ;;  %v1424_v47 = vmax.bf16 %v2856_v9, %v1416_v38  ;;  %1624 = vmatprep.mubr.bf16.mxu1 %v1446_v36  ;;  %v2751_v30 = vld [vmem:[%s3758_s5 + $0x10] sm:$0xff]  }
 0x174   : > { %v1387_v12 = vmul.bf16 %v3465_v60, %v1371_v4  ;;  %1625 = vmatmul.mubr.bf16.gmra.mxu1 %v1445_v50  ;;  %v1439_v14 = vmul.bf16 %v3471_v46, %v1423_v19  ;;  %v2755_v62 = vld [vmem:[%s3760_s7 + $0x30] sm:$0xff]   ;;  %2516 = vmatprep.subr.bf16.mxu1 %v2754_v24  ;;  %v1653_v56 = vpack.c.bf16 %v1451_v1, %v1451_v1 }
 0x175   : > { %v1331_v53 = vpack.c.bf16 %v1321_v41, %v1317_v13  ;;  %v1323_v40 = vadd.f32 %v1322_v28, %v1250_v8  ;;  %v1388_v18 = vmul.bf16 %v3476_v27, %v1372_v17  ;;  %v1440_v57 = vmul.bf16 %v3480_v34, %v1424_v47  ;;  %2517 = vmatpush3.bf16.msra.mxu1 %v2754_v24 }
 0x176   : > { %v1395_v63 = vadd.bf16 %v1387_v12, %v1339_v52  ;;  %2518 = vmatprep.subr.bf16.mxu1 %v2755_v62  ;;  %v1659_v35 = vshrl.u32 %v1653_v56, 16  ;;  %v1487_v31 = vrot.slane %v1451_v1, %v3411_v45  ;;  %v1686_v36 = vpack.i.b16 %v1653_v56, %v1653_v56 }
 0x177   : > { %v1365_v58 = vsub.bf16 %v3446_v16, %v1331_v53  ;;  %v1332_v23 = vpack.c.bf16 %v1323_v40, %v1319_v51  ;;  %v1396_v61 = vadd.bf16 %v1388_v18, %v1340_v3  ;;  %v1417_v15 = vsub.bf16 %v3449_v55, %v1331_v53 }
 0x178   : > { %v1447_v48 = vadd.bf16 %v1439_v14, %v1395_v63  ;;  %v1660_v32 = vpack.i.b16 %v1659_v35, %v1659_v35  ;;  %v3606_v28 = vrot.slane %v1686_v36, %v3440_v2 }
 0x179   : > { %v1366_v20 = vsub.bf16 %v3458_v11, %v1332_v23  ;;  %v1418_v5 = vsub.bf16 %v3452_v42, %v1332_v23  ;;  %v1448_v54 = vadd.bf16 %v1440_v57, %v1396_v61  ;;  %v1373_v59 = vmax.bf16 %v2856_v9, %v1365_v58  ;;  %2519 = vmatpush3.bf16.msra.mxu1 %v2755_v62 }
 0x17a   : > { %v1342_v37 = vmax.bf16 %v2856_v9, %v1332_v23  ;;  %v1341_v11 = vmax.bf16 %v2856_v9, %v1331_v53  ;;  %v1425_v42 = vmax.bf16 %v2856_v9, %v1417_v15  ;;  %2520 = vmatprep.subr.bf16.mxu1 %v2756_v44  ;;  %v3603_v47 = vrot.slane %v1660_v32, %v3438_v0 }
 0x17b   : > { %1632 = vmatprep.mubr.bf16.mxu1 %v1448_v54  ;;  %v1374_v6 = vmax.bf16 %v2856_v9, %v1366_v20  ;;  %v1426_v16 = vmax.bf16 %v2856_v9, %v1418_v5  ;;  %v1389_v10 = vmul.bf16 %v3465_v60, %v1373_v59  ;;  %v2747_v60 = vld [vmem:[%s3758_s5 + $0x30] sm:$0xff]   ;;  %v1677_v40 = vrot.slane %v1660_v32, %v3411_v45 }
 0x17c   : > { %1633 = vmatmul.mubr.bf16.gmra.mxu1 %v1447_v48  ;;  %v1441_v43 = vmul.bf16 %v3471_v46, %v1425_v42  ;;  %2494 = vmatprep.subr.bf16.mxu0 %v2747_v60  ;;  %v2750_v46 = vld [vmem:[%s3758_s5 + $0x18] sm:$0xff]   ;;  %v1703_v23 = vrot.slane %v1686_v36, %v3438_v0 }
 0x17d   : > { %v1390_v55 = vmul.bf16 %v3476_v27, %v1374_v6  ;;  %v1442_v39 = vmul.bf16 %v3480_v34, %v1426_v16  ;;  %v1397_v25 = vadd.bf16 %v1389_v10, %v1341_v11  ;;  %2495 = vmatpush3.bf16.msra.mxu0 %v2747_v60  ;;  %v2748_v27 = vld [vmem:[%s3758_s5 + $0x28] sm:$0xff]   ;;  %v2749_v34 = vld [vmem:[%s3758_s5 + $0x20] sm:$0xff]   ;;  %2521 = vmatpush3.bf16.msra.mxu1 %v2756_v44 }
 0x17e   : > { %2496 = vmatprep.subr.bf16.mxu0 %v2748_v27 }
 0x17f   : > { %v1398_v22 = vadd.bf16 %v1390_v55, %v1342_v37  ;;  %v1449_v26 = vadd.bf16 %v1441_v43, %v1397_v25 }
 0x181   : > { %v1450_v21 = vadd.bf16 %v1442_v39, %v1398_v22  ;;  %2497 = vmatpush3.bf16.msra.mxu0 %v2748_v27 }
 0x182   : > { %2498 = vmatprep.subr.bf16.mxu0 %v2749_v34 }
 0x183   : > { %1640 = vmatprep.mubr.bf16.mxu1 %v1450_v21 }
 0x184   : > { %1641 = vmatmul.mubr.bf16.gmra.mxu1 %v1449_v26 }
 0x185   : > { %2499 = vmatpush3.bf16.msra.mxu0 %v2749_v34 }
 0x186   : > { %2500 = vmatprep.subr.bf16.mxu0 %v2750_v46 }
 0x189   : > { %2501 = vmatpush3.bf16.msra.mxu0 %v2750_v46 }
 0x18a   : > { %2502 = vmatprep.subr.bf16.mxu0 %v2751_v30 }
 0x18d   : > { %2503 = vmatpush3.bf16.msra.mxu0 %v2751_v30 }
 0x18e   : > { %2504 = vmatprep.subr.bf16.mxu0 %v2752_v49 }
 0x191   : > { %2505 = vmatpush3.bf16.msra.mxu0 %v2752_v49 }
 0x192   : > { %2506 = vmatprep.subr.bf16.mxu0 %v2753_v33 }
 0x195   : > { %2507 = vmatpush3.bf16.msra.mxu0 %v2753_v33 }
 0x22c   : > { %v2444_v29 = vpop.f32.mrf.mxu1 }
 0x22e   : > { %v2445_v38 = vpop.f32.mrf.mxu1 }
 0x22f   : > { %v2446_v13 = vadd.f32 %v2445_v38, %v2444_v29 }
 0x230   : > { %v2447_v7 = vpop.f32.mrf.mxu1 }
 0x231   : > { %v1619_v8 = vadd.f32 %v2446_v13, %v1487_v31 }
 0x232   : > { %v2448_v50 = vpop.f32.mrf.mxu1 }
 0x233   : > { %v2449_v4 = vadd.f32 %v2448_v50, %v2447_v7 }
 0x234   : > { %v2450_v41 = vpop.f32.mrf.mxu1 }
 0x235   : > { %v1622_v17 = vadd.f32 %v2449_v4, %v1487_v31 }
 0x236   : > { %v2451_v3 = vpop.f32.mrf.mxu1 }
 0x237   : > { %v1649_v52 = vpack.c.bf16 %v1622_v17, %v1619_v8  ;;  %v2452_v53 = vadd.f32 %v2451_v3, %v2450_v41 }
 0x238   : > { %v2453_v12 = vpop.f32.mrf.mxu1 }
 0x239   : > { %v1666_v19 = vsub.bf16 %v3603_v47, %v1649_v52  ;;  %v1692_v51 = vsub.bf16 %v3606_v28, %v1649_v52  ;;  %v1627_v14 = vadd.f32 %v2452_v53, %v1487_v31  ;;  %v1654_v20 = vmax.bf16 %v2856_v9, %v1649_v52 }
 0x23a   : > { %v2454_v18 = vpop.f32.mrf.mxu1 }
 0x23b   : > { %v2455_v57 = vadd.f32 %v2454_v18, %v2453_v12  ;;  %v1670_v58 = vmax.bf16 %v2856_v9, %v1666_v19  ;;  %v1696_v63 = vmax.bf16 %v2856_v9, %v1692_v51 }
 0x23c   : > { %v2456_v61 = vpop.f32.mrf.mxu1 }
 0x23d   : > { %v1630_v15 = vadd.f32 %v2455_v57, %v1487_v31  ;;  %v1678_v5 = vmul.bf16 %v1677_v40, %v1670_v58  ;;  %v1704_v16 = vmul.bf16 %v1703_v23, %v1696_v63  ;;  %v2757_v57 = vld [vmem:[%s3760_s7 + $0x20] sm:$0xff]  }
 0x23e   : > { %v2457_v54 = vpop.f32.mrf.mxu1  ;;  %2522 = vmatprep.subr.bf16.mxu1 %v2757_v57  ;;  %v2761_v58 = vld [vmem:[%s3760_s7] sm:$0xff]  }
 0x23f   : > { %v1650_v59 = vpack.c.bf16 %v1630_v15, %v1627_v14  ;;  %v1682_v48 = vadd.bf16 %v1678_v5, %v1654_v20  ;;  %v2458_v55 = vadd.f32 %v2457_v54, %v2456_v61  ;;  %2523 = vmatpush3.bf16.msra.mxu1 %v2757_v57 }
 0x240   : > { %v2459_v6 = vpop.f32.mrf.mxu1 }
 0x241   : > { %v1667_v10 = vsub.bf16 %v3603_v47, %v1650_v59  ;;  %v1693_v37 = vsub.bf16 %v3606_v28, %v1650_v59  ;;  %v1708_v42 = vadd.bf16 %v1704_v16, %v1682_v48  ;;  %v1655_v43 = vmax.bf16 %v2856_v9, %v1650_v59 }
 0x242   : > { %v2460_v11 = vpop.f32.mrf.mxu1  ;;  %v1635_v60 = vadd.f32 %v2458_v55, %v1487_v31 }
 0x243   : > { %v1671_v22 = vmax.bf16 %v2856_v9, %v1667_v10  ;;  %v1697_v39 = vmax.bf16 %v2856_v9, %v1693_v37  ;;  %v2461_v25 = vadd.f32 %v2460_v11, %v2459_v6  ;;  %2508 = vmatprep.mubr.bf16.mxu0 %v1708_v42 }
 0x244   : > { %v2462_v21 = vpop.f32.mrf.mxu1 }
 0x245   : > { %v1679_v26 = vmul.bf16 %v1677_v40, %v1671_v22  ;;  %v1638_v27 = vadd.f32 %v2461_v25, %v1487_v31  ;;  %v1705_v30 = vmul.bf16 %v1703_v23, %v1697_v39 }
 0x246   : > { %v2463_v34 = vpop.f32.mrf.mxu1 }
 0x247   : > { %v1683_v46 = vadd.bf16 %v1679_v26, %v1655_v43  ;;  %v1651_v49 = vpack.c.bf16 %v1638_v27, %v1635_v60  ;;  %v2464_v44 = vadd.f32 %v2463_v34, %v2462_v21 }
 0x248   : > { %v2465_v33 = vpop.f32.mrf.mxu1 }
 0x249   : > { %v1668_v24 = vsub.bf16 %v3603_v47, %v1651_v49  ;;  %v1694_v62 = vsub.bf16 %v3606_v28, %v1651_v49  ;;  %v1709_v1 = vadd.bf16 %v1705_v30, %v1683_v46  ;;  %v1643_v7 = vadd.f32 %v2464_v44, %v1487_v31 }
 0x24a   : > { %v2466_v56 = vpop.f32.mrf.mxu1  ;;  %v1656_v32 = vmax.bf16 %v2856_v9, %v1651_v49 }
 0x24b   : > { %v2467_v29 = vadd.f32 %v2466_v56, %v2465_v33  ;;  %2509 = vmatmul.mubr.bf16.vlgmr.msra.gmra.mxu0 %v1709_v1  ;;  %v1672_v35 = vmax.bf16 %v2856_v9, %v1668_v24  ;;  %v1698_v38 = vmax.bf16 %v2856_v9, %v1694_v62 }
 0x24d   : > { %v1646_v13 = vadd.f32 %v2467_v29, %v1487_v31  ;;  %v1680_v36 = vmul.bf16 %v1677_v40, %v1672_v35  ;;  %v1706_v41 = vmul.bf16 %v1703_v23, %v1698_v38 }
 0x24f   : > { %v1652_v50 = vpack.c.bf16 %v1646_v13, %v1643_v7  ;;  %v1684_v4 = vadd.bf16 %v1680_v36, %v1656_v32 }
 0x251   : > { %v1669_v8 = vsub.bf16 %v3603_v47, %v1652_v50  ;;  %v1695_v17 = vsub.bf16 %v3606_v28, %v1652_v50  ;;  %v1710_v3 = vadd.bf16 %v1706_v41, %v1684_v4  ;;  %v1657_v19 = vmax.bf16 %v2856_v9, %v1652_v50  ;;  %v2758_v47 = vld [vmem:[%s3760_s7 + $0x18] sm:$0xff]   ;;  %v2759_v28 = vld [vmem:[%s3760_s7 + $0x10] sm:$0xff]  }
 0x252   : > { %2524 = vmatprep.subr.bf16.mxu1 %v2758_v47 }
 0x253   : > { %2512 = vmatprep.mubr.bf16.mxu0 %v1710_v3  ;;  %v1673_v52 = vmax.bf16 %v2856_v9, %v1669_v8  ;;  %v1699_v12 = vmax.bf16 %v2856_v9, %v1695_v17  ;;  %2525 = vmatpush3.bf16.msra.mxu1 %v2758_v47 }
 0x254   : > { %2526 = vmatprep.subr.bf16.mxu1 %v2759_v28 }
 0x255   : > { %v1681_v51 = vmul.bf16 %v1677_v40, %v1673_v52  ;;  %v1707_v53 = vmul.bf16 %v1703_v23, %v1699_v12  ;;  %v2760_v40 = vld [vmem:[%s3760_s7 + $0x8] sm:$0xff]   ;;  %v1712_v23 = vld [vmem:[%s3759_s6] sm:$0x1f] }
 0x256   : > { %v1850_v61 = vpack.c.bf16 %v1712_v23, %v1712_v23  ;;  %v1732_v15 = vrot.slane %v1712_v23, %v3411_v45 }
 0x257   : > { %v1685_v31 = vadd.bf16 %v1681_v51, %v1657_v19  ;;  %2527 = vmatpush3.bf16.msra.mxu1 %v2759_v28 }
 0x258   : > { %2528 = vmatprep.subr.bf16.mxu1 %v2760_v40  ;;  %v1856_v63 = vshrl.u32 %v1850_v61, 16  ;;  %v1883_v54 = vpack.i.b16 %v1850_v61, %v1850_v61 }
 0x259   : > { %v1711_v18 = vadd.bf16 %v1707_v53, %v1685_v31 }
 0x25a   : > { %v1857_v20 = vpack.i.b16 %v1856_v63, %v1856_v63  ;;  %v1888_v10 = vrot.slane %v1883_v54, %v3440_v2  ;;  %v1900_v30 = vrot.slane %v1883_v54, %v3438_v0 }
 0x25b   : > { %2513 = vmatmul.mubr.bf16.gmra.mxu0 %v1711_v18  ;;  %2529 = vmatpush3.bf16.msra.mxu1 %v2760_v40 }
 0x25c   : > { %2530 = vmatprep.subr.bf16.mxu1 %v2761_v58  ;;  %v1862_v16 = vrot.slane %v1857_v20, %v3438_v0  ;;  %v1874_v39 = vrot.slane %v1857_v20, %v3411_v45 }
 0x25f   : > { %2531 = vmatpush3.bf16.msra.mxu1 %v2761_v58 }
 0x30b   : > { %v2510_v14 = vpop.f32.mrf.mxu0 }
 0x30c   : > { %v1824_v48 = vadd.f32 %v2510_v14, %v1732_v15  ;;  %v2374_v14 = vld [vmem:[%s3761_s8] ss:$0 sm:$0xff] }
 0x30d   : > { %v1815_v5 = vpop.f32.mrf.mxu0 }
 0x30e   : > { %v1816_v55 = vadd.f32 %v1815_v5, %v1732_v15 }
 0x30f   : > { %v2511_v59 = vpop.f32.mrf.mxu0 }
 0x310   : > { %v1827_v6 = vadd.f32 %v2511_v59, %v1732_v15 }
 0x311   : > { %v1818_v37 = vpop.f32.mrf.mxu0 }
 0x312   : > { %v1847_v11 = vpack.c.bf16 %v1827_v6, %v1824_v48  ;;  %v1819_v42 = vadd.f32 %v1818_v37, %v1732_v15 }
 0x314   : > { %v1864_v22 = vsub.bf16 %v1862_v16, %v1847_v11  ;;  %v1846_v25 = vpack.c.bf16 %v1819_v42, %v1816_v55  ;;  %v1890_v21 = vsub.bf16 %v1888_v10, %v1847_v11  ;;  %v1852_v46 = vmax.bf16 %v2856_v9, %v1847_v11 }
 0x316   : > { %v1868_v43 = vmax.bf16 %v2856_v9, %v1864_v22  ;;  %v1863_v26 = vsub.bf16 %v1862_v16, %v1846_v25  ;;  %v1889_v60 = vsub.bf16 %v1888_v10, %v1846_v25  ;;  %v1894_v2 = vmax.bf16 %v2856_v9, %v1890_v21 }
 0x317   : > { %v1851_v33 = vmax.bf16 %v2856_v9, %v1846_v25 }
 0x318   : > { %v1876_v27 = vmul.bf16 %v1874_v39, %v1868_v43  ;;  %v1867_v34 = vmax.bf16 %v2856_v9, %v1863_v26  ;;  %v1893_v49 = vmax.bf16 %v2856_v9, %v1889_v60  ;;  %v1902_v56 = vmul.bf16 %v1900_v30, %v1894_v2 }
 0x31a   : > { %v1875_v45 = vmul.bf16 %v1874_v39, %v1867_v34  ;;  %v1880_v24 = vadd.bf16 %v1876_v27, %v1852_v46  ;;  %v1901_v1 = vmul.bf16 %v1900_v30, %v1893_v49 }
 0x31b   : > { %v2514_v62 = vpop.f32.mrf.mxu0 }
 0x31c   : > { %v1879_v44 = vadd.bf16 %v1875_v45, %v1851_v33  ;;  %v1906_v38 = vadd.bf16 %v1902_v56, %v1880_v24  ;;  %v1840_v13 = vadd.f32 %v2514_v62, %v1732_v15 }
 0x31d   : > { %v1831_v29 = vpop.f32.mrf.mxu0 }
 0x31e   : > { %v1905_v35 = vadd.bf16 %v1901_v1, %v1879_v44  ;;  %v1832_v0 = vadd.f32 %v1831_v29, %v1732_v15 }
 0x31f   : > { %v2515_v7 = vpop.f32.mrf.mxu0 }
 0x320   : > { %v1843_v32 = vadd.f32 %v2515_v7, %v1732_v15  ;;  %2532 = vmatprep.mubr.bf16.mxu1 %v1905_v35 }
 0x321   : > { %v1834_v36 = vpop.f32.mrf.mxu0  ;;  %2533 = vmatmul.mubr.bf16.vlgmr.msra.gmra.mxu1 %v1906_v38 }
 0x322   : > { %v1849_v50 = vpack.c.bf16 %v1843_v32, %v1840_v13  ;;  %v1835_v4 = vadd.f32 %v1834_v36, %v1732_v15 }
 0x324   : > { %v1866_v41 = vsub.bf16 %v1862_v16, %v1849_v50  ;;  %v1848_v8 = vpack.c.bf16 %v1835_v4, %v1832_v0  ;;  %v1892_v17 = vsub.bf16 %v1888_v10, %v1849_v50  ;;  %v1854_v53 = vmax.bf16 %v2856_v9, %v1849_v50 }
 0x326   : > { %v1870_v3 = vmax.bf16 %v2856_v9, %v1866_v41  ;;  %v1865_v52 = vsub.bf16 %v1862_v16, %v1848_v8  ;;  %v1891_v12 = vsub.bf16 %v1888_v10, %v1848_v8  ;;  %v1896_v18 = vmax.bf16 %v2856_v9, %v1892_v17 }
 0x327   : > { %v1853_v57 = vmax.bf16 %v2856_v9, %v1848_v8 }
 0x328   : > { %v1869_v19 = vmax.bf16 %v2856_v9, %v1865_v52  ;;  %v1895_v51 = vmax.bf16 %v2856_v9, %v1891_v12  ;;  %v1878_v31 = vmul.bf16 %v1874_v39, %v1870_v3  ;;  %v1904_v23 = vmul.bf16 %v1900_v30, %v1896_v18 }
 0x32a   : > { %v1877_v47 = vmul.bf16 %v1874_v39, %v1869_v19  ;;  %v1882_v28 = vadd.bf16 %v1878_v31, %v1854_v53  ;;  %v1903_v58 = vmul.bf16 %v1900_v30, %v1895_v51 }
 0x32c   : > { %v1881_v40 = vadd.bf16 %v1877_v47, %v1853_v57  ;;  %v1908_v63 = vadd.bf16 %v1904_v23, %v1882_v28 }
 0x32e   : > { %v1907_v61 = vadd.bf16 %v1903_v58, %v1881_v40 }
 0x330   : > { %2536 = vmatprep.mubr.bf16.mxu1 %v1907_v61 }
 0x331   : > { %2537 = vmatmul.mubr.bf16.gmra.mxu1 %v1908_v63 }
 0x3e1   : > { %v2534_v15 = vpop.f32.mrf.mxu1 }
 0x3e2   : > { %v2023_v20 = vadd.f32 %v2534_v15, %v2374_v14 }
 0x3e3   : > { %v2014_v5 = vpop.f32.mrf.mxu1 }
 0x3e4   : > { %v2015_v54 = vadd.f32 %v2374_v14, %v2014_v5  ;;  %2049 = vmax.xlane.f32.xlu1 %v2023_v20 }
 0x3e5   : > { %v2535_v59 = vpop.f32.mrf.mxu1 }
 0x3e6   : > { %v2026_v9 = vadd.f32 %v2535_v59, %v2374_v14  ;;  %2045 = vmax.xlane.f32.xlu0 %v2015_v54 }
 0x3e7   : > { %v2017_v48 = vpop.f32.mrf.mxu1 }
 0x3e8   : > { %v2018_v6 = vadd.f32 %v2374_v14, %v2017_v48  ;;  %2051 = vmax.xlane.f32.xlu1 %v2026_v9 }
 0x3ea   : > { %2047 = vmax.xlane.f32.xlu0 %v2018_v6 }
 0x3f1   : > { %v2538_v16 = vpop.f32.mrf.mxu1 }
 0x3f2   : > { %v2039_v42 = vadd.f32 %v2538_v16, %v2374_v14 }
 0x3f3   : > { %v2030_v10 = vpop.f32.mrf.mxu1 }
 0x3f4   : > { %v2031_v37 = vadd.f32 %v2374_v14, %v2030_v10 }
 0x3f5   : > { %v2539_v55 = vpop.f32.mrf.mxu1 }
 0x3f6   : > { %2053 = vmax.xlane.f32.xlu0 %v2031_v37  ;;  %v2042_v39 = vadd.f32 %v2539_v55, %v2374_v14 }
 0x3f7   : > { %v2033_v11 = vpop.f32.mrf.mxu1 }
 0x3f8   : > { %v2034_v22 = vadd.f32 %v2374_v14, %v2033_v11 }
 0x3fa   : > { %2055 = vmax.xlane.f32.xlu1 %v2034_v22  ;;  %2057 = vmax.xlane.f32.xlu0 %v2039_v42 }
 0x3fe   : > { %2059 = vmax.xlane.f32.xlu1 %v2042_v39 }
 0x46d   : > { %v2050_v25 = vpop.xlane.xlu1 %2049 }
 0x46e   : > { %v3668_v21 = vsub.f32 %v2023_v20, %v2050_v25 }
 0x46f   : > { %v2046_v43 = vpop.xlane.xlu0 %2045 }
 0x470   : > { %v2073_v26 = vmul.f32 1.442695, %v3668_v21  ;;  %v3671_v60 = vsub.f32 %v2015_v54, %v2046_v43 }
 0x471   : > { %v2052_v27 = vpop.xlane.xlu1 %2051 }
 0x472   : > { %2762 = vpow2.f32 %v2073_v26  ;;  %v2069_v34 = vmul.f32 1.442695, %v3671_v60  ;;  %v3674_v46 = vsub.f32 %v2026_v9, %v2052_v27 }
 0x473   : > { %v2048_v2 = vpop.xlane.xlu0 %2047 }
 0x474   : > { %v2075_v30 = vmul.f32 1.442695, %v3674_v46  ;;  %v3677_v49 = vsub.f32 %v2018_v6, %v2048_v2  ;;  %2764 = vpow2.f32 %v2069_v34 }
 0x476   : > { %2766 = vpow2.f32 %v2075_v30  ;;  %v2071_v33 = vmul.f32 1.442695, %v3677_v49 }
 0x478   : > { %2768 = vpow2.f32 %v2071_v33 }
 0x47f   : > { %v2763_v45 = vpop.eup %2762  ;;  %v2054_v24 = vpop.xlane.xlu0 %2053 }
 0x480   : > { %v3680_v62 = vsub.f32 %v2031_v37, %v2054_v24  ;;  %2089 = vadd.xlane.f32.xlu0 %v2763_v45 }
 0x481   : > { %v2765_v44 = vpop.eup %2764 }
 0x482   : > { %v2077_v1 = vmul.f32 1.442695, %v3680_v62 }
 0x483   : > { %v2767_v56 = vpop.eup %2766  ;;  %v2056_v29 = vpop.xlane.xlu1 %2055 }
 0x484   : > { %v2058_v35 = vpop.xlane.xlu0 %2057  ;;  %2770 = vpow2.f32 %v2077_v1  ;;  %v3683_v38 = vsub.f32 %v2034_v22, %v2056_v29  ;;  %2091 = vadd.xlane.f32.xlu1 %v2767_v56  ;;  %2085 = vadd.xlane.f32.xlu0 %v2765_v44 }
 0x485   : > { %v3685_v7 = vsub.f32 %v2039_v42, %v2058_v35  ;;  %v2769_v36 = vpop.eup %2768 }
 0x486   : > { %v2079_v13 = vmul.f32 1.442695, %v3683_v38 }
 0x487   : > { %v2081_v32 = vmul.f32 1.442695, %v3685_v7  ;;  %v2060_v0 = vpop.xlane.xlu1 %2059 }
 0x488   : > { %2772 = vpow2.f32 %v2079_v13  ;;  %v3689_v50 = vsub.f32 %v2042_v39, %v2060_v0  ;;  %2087 = vadd.xlane.f32.xlu1 %v2769_v36 }
 0x489   : > { %2774 = vpow2.f32 %v2081_v32 }
 0x48a   : > { %v2083_v4 = vmul.f32 1.442695, %v3689_v50 }
 0x48c   : > { %2776 = vpow2.f32 %v2083_v4 }
 0x491   : > { %v2771_v41 = vpop.eup %2770 }
 0x492   : > { %2093 = vadd.xlane.f32.xlu0 %v2771_v41 }
 0x495   : > { %v2773_v8 = vpop.eup %2772 }
 0x496   : > { %v2775_v17 = vpop.eup %2774  ;;  %2095 = vadd.xlane.f32.xlu1 %v2773_v8 }
 0x497   : > { %2097 = vadd.xlane.f32.xlu0 %v2775_v17 }
 0x499   : > { %v2777_v3 = vpop.eup %2776 }
 0x49a   : > { %2099 = vadd.xlane.f32.xlu1 %v2777_v3 }
 0x509   : > { %v2090_v52 = vpop.xlane.xlu0 %2089 }
 0x50a   : > { %2778 = vlog2.f32 %v2090_v52 }
 0x50d   : > { %v2092_v12 = vpop.xlane.xlu1 %2091  ;;  %v2086_v19 = vpop.xlane.xlu0 %2085 }
 0x50e   : > { %2780 = vlog2.f32 %v2092_v12 }
 0x50f   : > { %2782 = vlog2.f32 %v2086_v19 }
 0x511   : > { %v2088_v51 = vpop.xlane.xlu1 %2087 }
 0x512   : > { %2784 = vlog2.f32 %v2088_v51 }
 0x517   : > { %v2779_v31 = vpop.eup %2778 }
 0x518   : > { %v2106_v53 = vmul.f32 0.6931472, %v2779_v31 }
 0x51a   : > { %v2119_v40 = vsub.f32 %v3668_v21, %v2106_v53 }
 0x51b   : > { %v2781_v18 = vpop.eup %2780  ;;  %v2094_v57 = vpop.xlane.xlu0 %2093 }
 0x51c   : > { %v2783_v47 = vpop.eup %2782  ;;  %v2108_v28 = vmul.f32 0.6931472, %v2781_v18  ;;  %2786 = vlog2.f32 %v2094_v57 }
 0x51d   : > { %v2102_v23 = vmul.f32 0.6931472, %v2783_v47 }
 0x51e   : > { %v2120_v58 = vsub.f32 %v3674_v46, %v2108_v28 }
 0x51f   : > { %v2785_v61 = vpop.eup %2784  ;;  %v2096_v63 = vpop.xlane.xlu1 %2095  ;;  %v2117_v5 = vsub.f32 %v3671_v60, %v2102_v23 }
 0x520   : > { %v2413_v14 = vpack.c.bf16 %v2120_v58, %v2119_v40  ;;  %v2104_v15 = vmul.f32 0.6931472, %v2785_v61  ;;  %2788 = vlog2.f32 %v2096_v63  ;;  %v2098_v20 = vpop.xlane.xlu0 %2097 }
 0x521   : > { %2790 = vlog2.f32 %v2098_v20 }
 0x522   : > { %2425 = vst [vmem:[%s328_s23 + $0x8] sm:$0xff] %v2413_v14   ;;  %v2118_v54 = vsub.f32 %v3677_v49, %v2104_v15 }
 0x523   : > { %v2100_v59 = vpop.xlane.xlu1 %2099 }
 0x524   : > { %v2408_v9 = vpack.c.bf16 %v2118_v54, %v2117_v5  ;;  %2792 = vlog2.f32 %v2100_v59 }
 0x526   : > { %2409 = vst [vmem:[%s328_s23] sm:$0xff] %v2408_v9  }
 0x529   : > { %v2787_v48 = vpop.eup %2786 }
 0x52a   : > { %v2110_v6 = vmul.f32 0.6931472, %v2787_v48 }
 0x52c   : > { %v2121_v55 = vsub.f32 %v3680_v62, %v2110_v6 }
 0x52d   : > { %v2789_v16 = vpop.eup %2788 }
 0x52e   : > { %v2791_v10 = vpop.eup %2790  ;;  %v2112_v37 = vmul.f32 0.6931472, %v2789_v16 }
 0x52f   : > { %v2114_v42 = vmul.f32 0.6931472, %v2791_v10 }
 0x530   : > { %v2122_v11 = vsub.f32 %v3683_v38, %v2112_v37 }
 0x531   : > { %v2793_v22 = vpop.eup %2792  ;;  %v2123_v21 = vsub.f32 %v3685_v7, %v2114_v42 }
 0x532   : > { %v2418_v39 = vpack.c.bf16 %v2122_v11, %v2121_v55  ;;  %v2116_v25 = vmul.f32 0.6931472, %v2793_v22 }
 0x534   : > { %2426 = vst [vmem:[%s328_s23 + $0x10] sm:$0xff] %v2418_v39   ;;  %v2124_v43 = vsub.f32 %v3689_v50, %v2116_v25 }
 0x536   : > { %v2423_v26 = vpack.c.bf16 %v2124_v43, %v2123_v21 }
 0x538   : > { %2427 = vst [vmem:[%s328_s23 + $0x18] sm:$0xff] %v2423_v26  }
 0x539   : > { %2807 = shalt.err (!%p2804_p3)
}
 0x53a   : > { %s2808_s21 = scalar_lea.hbm %s3707_s26, 512  ;;  %s2812_s24 = scalar_lea.hbm %s3762_s9, 1024 }
 0x53b   : > { %p2809_p4 = scmp.ne.s32.totalorder %s3707_s26, %s2808_s21  ;;  %p2813_p9 = scmp.lt.s32.totalorder %s3707_s26, %s3762_s9 }
 0x53c   : > { %p2814_p10 = scmp.lt.s32.totalorder %s2812_s24, %s2808_s21 }
 0x53d   : > { %p2810_p7 = pnand %p2809_p4, %p2948_p5 }
 0x53e   : > { %p2815_p11 = por %p2814_p10, %p2813_p9 }
 0x53f   : > { %p2811_p8 = pneg %p2810_p7 }
 0x541   : > { %p2816_p12 = pnand %p2815_p11, %p2811_p8 }
 0x543   : > { %2819 = shalt.err (!%p2816_p12)
}
 0x544   : > { %s2858_s29 = smov 64   ;;  %s2859_s27 = smov 4  }
 0x545   : > { %2541 = dma.vmem_to_hbm [thread:$0]  (%p2948_p5), %s3709_s14, 512, %s3707_s26, %s3713_s13, %s2858_s29, %s2858_s29, %s2859_s27  }
 0x546 PF: > { %p2547_p13 = scmp.ge.s32.totalorder %s2854_s12, 2  ;;  %s2194_s16 = sand.u32 1, %s2842_s30  }
 0x547   : > { %s2195_s17 = scalar_lea.sflag [#allocation3], %s2194_s16 }
 0x548   : > { %p2544_p0 = pnand %p2547_p13, %p2952_p6 }
 0x54a   : > { %p2545_p1 = pneg %p2544_p0 }
 0x54c   : > { %2837 = dma.done.wait (%p2545_p1), %s2195_s17, 512  }
 0x54d   : > { %2839 = vsyncadd (%p2545_p1), %s2195_s17, 4294966784  ;;  %p19_p2 = scmp.ge.s32.totalorder %s2935_s15, 4   ;;  %s3765_s30 = smov %s2846_s10 }
 0x54e   : > { %s3766_s10 = smov %s2850_s11  ;;  %s3767_s11 = smov %s2946_s18 }
 0x54f   : > { %s3768_s12 = smov %s2935_s15  ;;  %21 = sbr.rel (!%p19_p2) target bundleno = 3 (0x3), region = 91 }
 0x554   :  { %2200 = vsyncpa [#allocation3], 1 }
 0x555   :  { %2202 = vsyncpa [#allocation3 + $0x1], 1 }

</bundles_post_ra>
